<compile_context>
chip_gen: v6e
topology: v6e:2x2x1
jax: 0.10.0
libtpu: 0.0.40
codegen_flags: <defaults>
</compile_context>

<pallas_src>
import functools

import jax
import jax.numpy as jnp
from jax.experimental import pallas as pl
from jax.experimental.pallas import tpu as pltpu

_NUM_GROUPS = 32
_EPS = 1e-6


# --------------------------------------------------------------------------
# Fused path (small N): GroupNorm + QKV + full attention + proj + residual.
# --------------------------------------------------------------------------
def _fused_gn_attn_kernel(x_ref, g_ref, gt_ref, gamma_ref, beta_ref,
                          wqkv_ref, bqkv_ref, wp_ref, bp_ref, o_ref):
    x = x_ref[0].astype(jnp.float32)                       # (N, C)
    n, c = x.shape
    ng = g_ref.shape[1]
    denom = float(n * (c // ng))
    mxu = wqkv_ref.dtype                                   # bf16 (or f32) MXU operands

    # GroupNorm stats (biased variance, like torch.nn.GroupNorm); per-group
    # reductions expressed as tiny one-hot matmuls, kept in f32.
    s = jnp.sum(x, axis=0, keepdims=True)                  # (1, C)
    ss = jnp.sum(x * x, axis=0, keepdims=True)             # (1, C)
    gsum = jnp.dot(s, g_ref[...], preferred_element_type=jnp.float32)   # (1, G)
    gsq = jnp.dot(ss, g_ref[...], preferred_element_type=jnp.float32)   # (1, G)
    gmean = gsum / denom
    gvar = jnp.maximum(gsq / denom - gmean * gmean, 0.0)   # clamp f32 cancellation
    ginv = jax.lax.rsqrt(gvar + _EPS)
    mean_c = jnp.dot(gmean, gt_ref[...], preferred_element_type=jnp.float32)  # (1, C)
    inv_c = jnp.dot(ginv, gt_ref[...], preferred_element_type=jnp.float32)    # (1, C)

    hn = (x - mean_c) * inv_c
    hn = hn * gamma_ref[...] + beta_ref[...]

    # Fused QKV projection: one (N, C) x (C, 3C) matmul; scale already in Wq/bq.
    qkv = jnp.dot(hn.astype(mxu), wqkv_ref[...],
                  preferred_element_type=jnp.float32) + bqkv_ref[...]
    q = qkv[:, :c].astype(mxu)
    k = qkv[:, c:2 * c].astype(mxu)
    v = qkv[:, 2 * c:].astype(mxu)

    # scores[i, j] = sum_c q[i, c] * k[j, c]   (q @ k^T without materializing k^T)
    scores = jax.lax.dot_general(q, k, (((1,), (1,)), ((), ())),
                                 preferred_element_type=jnp.float32)     # (N, N)
    m = jnp.max(scores, axis=-1, keepdims=True)
    p = jnp.exp(scores - m)
    l = jnp.sum(p, axis=-1, keepdims=True)
    # Deferred normalization: attn@v first, then N*C muls + one EUP vrcp per row.
    out = jnp.dot(p.astype(mxu), v, preferred_element_type=jnp.float32)
    out = out * pl.reciprocal(l, approx=True)

    y = jnp.dot(out.astype(mxu), wp_ref[...],
                preferred_element_type=jnp.float32) + bp_ref[...]
    o_ref[0] = (x_ref[0].astype(jnp.float32) + y).astype(o_ref.dtype)


# --------------------------------------------------------------------------
# Tiled path (large N), pass 1: per-(batch, group) mean / rsqrt(var).
# --------------------------------------------------------------------------
def _gn_stats_kernel(x_ref, g_ref, gt_ref, mean_ref, inv_ref, *, denom):
    ri = pl.program_id(1)

    @pl.when(ri == 0)
    def _():
        mean_ref[...] = jnp.zeros_like(mean_ref)
        inv_ref[...] = jnp.zeros_like(inv_ref)

    x = x_ref[0].astype(jnp.float32)                       # (tm, C)
    mean_ref[0] = mean_ref[0] + jnp.sum(x, axis=0, keepdims=True)      # running sum
    inv_ref[0] = inv_ref[0] + jnp.sum(x * x, axis=0, keepdims=True)    # running sumsq

    @pl.when(ri == pl.num_programs(1) - 1)
    def _():
        gsum = jnp.dot(mean_ref[0], g_ref[...], preferred_element_type=jnp.float32)
        gsq = jnp.dot(inv_ref[0], g_ref[...], preferred_element_type=jnp.float32)
        gmean = gsum / denom
        gvar = jnp.maximum(gsq / denom - gmean * gmean, 0.0)
        ginv = jax.lax.rsqrt(gvar + _EPS)
        mean_ref[0] = jnp.dot(gmean, gt_ref[...], preferred_element_type=jnp.float32)
        inv_ref[0] = jnp.dot(ginv, gt_ref[...], preferred_element_type=jnp.float32)


# --------------------------------------------------------------------------
# Tiled path, pass 2: normalize + fused QKV projection, row tiles.
# --------------------------------------------------------------------------
def _norm_qkv_kernel(x_ref, mean_ref, inv_ref, gamma_ref, beta_ref,
                     wqkv_ref, bqkv_ref, q_ref, k_ref, v_ref):
    x = x_ref[0].astype(jnp.float32)                       # (tm, C)
    c = x.shape[1]
    mxu = wqkv_ref.dtype
    hn = (x - mean_ref[0]) * inv_ref[0]
    hn = hn * gamma_ref[...] + beta_ref[...]
    qkv = jnp.dot(hn.astype(mxu), wqkv_ref[...],
                  preferred_element_type=jnp.float32) + bqkv_ref[...]
    q_ref[0] = qkv[:, :c].astype(q_ref.dtype)
    k_ref[0] = qkv[:, c:2 * c].astype(k_ref.dtype)
    v_ref[0] = qkv[:, 2 * c:].astype(v_ref.dtype)


# --------------------------------------------------------------------------
# Tiled path, pass 3: flash attention (online softmax) + proj_out + residual.
# --------------------------------------------------------------------------
def _flash_attn_proj_kernel(q_ref, k_ref, v_ref, x_ref, wp_ref, bp_ref, o_ref,
                            m_sc, l_sc, acc_sc):
    kv = pl.program_id(2)

    @pl.when(kv == 0)
    def _():
        m_sc[...] = jnp.full_like(m_sc, -jnp.inf)
        l_sc[...] = jnp.zeros_like(l_sc)
        acc_sc[...] = jnp.zeros_like(acc_sc)

    q = q_ref[0]                                           # (tq, C), scale folded in
    k = k_ref[0]                                           # (tk, C)
    s = jax.lax.dot_general(q, k, (((1,), (1,)), ((), ())),
                            preferred_element_type=jnp.float32)          # (tq, tk)

    m_prev = m_sc[...]
    m_new = jnp.maximum(m_prev, jnp.max(s, axis=-1, keepdims=True))
    alpha = jnp.exp(m_prev - m_new)
    p = jnp.exp(s - m_new)
    l_sc[...] = alpha * l_sc[...] + jnp.sum(p, axis=-1, keepdims=True)
    acc_sc[...] = alpha * acc_sc[...] + jnp.dot(p.astype(v_ref.dtype), v_ref[0],
                                                preferred_element_type=jnp.float32)
    m_sc[...] = m_new

    @pl.when(kv == pl.num_programs(2) - 1)
    def _():
        out = acc_sc[...] * pl.reciprocal(l_sc[...], approx=True)   # deferred /l
        y = jnp.dot(out.astype(wp_ref.dtype), wp_ref[...],
                    preferred_element_type=jnp.float32) + bp_ref[...]
        o_ref[0] = (x_ref[0].astype(jnp.float32) + y).astype(o_ref.dtype)


# --------------------------------------------------------------------------
# Wrapper.
# --------------------------------------------------------------------------
def _tpu_vmem_budget():
    """(physical VMEM bytes, per-kernel vmem_limit_bytes) — generation aware."""
    try:
        cap = int(pltpu.get_tpu_info().vmem_capacity_bytes)
    except Exception:
        cap = 64 * 1024 * 1024                 # conservative (v7x-sized) fallback
    # ~75% of physical, capped at 100 MiB: ~96 MiB on v5e/v6e, ~48 MiB on v7x.
    return cap, int(min(cap * 3 // 4, 100 * 1024 * 1024))


def _divisor_tile(n, target):
    """Largest multiple of 8 that divides n and is <= target (or None)."""
    t = min(int(target), n)
    t -= t % 8
    while t >= 8:
        if n % t == 0:
            return t
        t -= 8
    return None


@functools.partial(jax.jit, static_argnames=("mxu_dtype", "fused_n_max",
                                              "block_m", "block_q", "block_k"))
def spatial_self_attention(x, gamma, beta, wq, bq, wk, bk, wv, bv, wp, bp, *,
                           mxu_dtype=jnp.bfloat16, fused_n_max=1024,
                           block_m=512, block_q=256, block_k=512):
    """SpatialSelfAttention.forward.

    x: (B, C, H, W).  NOTE: 1x1-conv weights must be passed as (C_in, C_out),
    i.e. torch `conv.weight[:, :, 0, 0].T`; biases / gamma / beta as (1, C).
    """
    b, c, h, w = x.shape
    n = h * w
    assert c % _NUM_GROUPS == 0, "GroupNorm(32, C) requires C % 32 == 0"
    group_size = c // _NUM_GROUPS
    out_dtype = x.dtype
    itemsize = jnp.dtype(out_dtype).itemsize
    mxu_itemsize = jnp.dtype(mxu_dtype).itemsize

    # Channels-last, spatial flattened: (B, N, C) with C on the lane axis.
    x_flat = jnp.transpose(x, (0, 2, 3, 1)).reshape(b, n, c)

    # One-hot group-membership matrices (constants) for the GroupNorm stats.
    grp = jnp.arange(c, dtype=jnp.int32) // group_size
    g_mat = (grp[:, None] == jnp.arange(_NUM_GROUPS, dtype=jnp.int32)[None, :]
             ).astype(jnp.float32)                          # (C, G)
    gt_mat = g_mat.T                                        # (G, C)

    # Fused QKV weight; the 1/sqrt(C) attention scale is folded into Wq/bq so
    # it costs nothing at runtime (equivalent to scaling q before q@k^T).
    scale = float(c) ** (-0.5)
    wqkv = jnp.concatenate([wq * scale, wk, wv], axis=1).astype(mxu_dtype)    # (C, 3C)
    bqkv = jnp.concatenate([bq * scale, bk, bv], axis=1).astype(jnp.float32)  # (1, 3C)
    wp_m = wp.astype(mxu_dtype)
    bp_f = bp.astype(jnp.float32)
    gamma_f = gamma.astype(jnp.float32)
    beta_f = beta.astype(jnp.float32)

    vmem_cap, vmem_limit = _tpu_vmem_budget()
    if vmem_cap <= 64 * 1024 * 1024:   # v7x: 64 MiB physical VMEM -> smaller tiles
        block_m = min(block_m, 256)
        block_q = min(block_q, 128)
        block_k = min(block_k, 256)

    use_fused = n <= fused_n_max
    if not use_fused:
        tm = _divisor_tile(n, block_m)
        tq = _divisor_tile(n, block_q)
        tk = _divisor_tile(n, block_k)
        if tm is None or tq is None or tk is None:
            # TODO(synk): pad + mask ragged N instead of the fused fallback.
            use_fused = True

    if use_fused:
        # --- Single fused kernel: no q/k/v HBM round-trip, one launch. ---
        cost = pl.CostEstimate(
            flops=int(b * (2 * n * c * 3 * c + 4 * n * n * c + 2 * n * c * c)),
            transcendentals=int(b * (n * n + n)),
            bytes_accessed=int(itemsize * 2 * b * n * c + mxu_itemsize * 4 * c * c),
        )
        out_flat = pl.pallas_call(
            _fused_gn_attn_kernel,
            out_shape=jax.ShapeDtypeStruct((b, n, c), out_dtype),
            grid_spec=pltpu.PrefetchScalarGridSpec(
                num_scalar_prefetch=0,
                grid=(b,),
                in_specs=[
                    pl.BlockSpec((1, n, c), lambda i: (i, 0, 0)),          # x
                    pl.BlockSpec((c, _NUM_GROUPS), lambda i: (0, 0)),      # G one-hot
                    pl.BlockSpec((_NUM_GROUPS, c), lambda i: (0, 0)),      # G^T
                    pl.BlockSpec((1, c), lambda i: (0, 0)),                # gamma
                    pl.BlockSpec((1, c), lambda i: (0, 0)),                # beta
                    pl.BlockSpec((c, 3 * c), lambda i: (0, 0)),            # Wqkv
                    pl.BlockSpec((1, 3 * c), lambda i: (0, 0)),            # bqkv
                    pl.BlockSpec((c, c), lambda i: (0, 0)),                # Wp
                    pl.BlockSpec((1, c), lambda i: (0, 0)),                # bp
                ],
                out_specs=pl.BlockSpec((1, n, c), lambda i: (i, 0, 0)),
            ),
            compiler_params=pltpu.CompilerParams(
                dimension_semantics=("parallel",),
                vmem_limit_bytes=vmem_limit,
            ),
            cost_estimate=cost,
        )(x_flat, g_mat, gt_mat, gamma_f, beta_f, wqkv, bqkv, wp_m, bp_f)
        return jnp.transpose(out_flat.reshape(b, h, w, c), (0, 3, 1, 2))

    # ---------------- Tiled path for large N ----------------
    # Pass 1: GroupNorm statistics over row tiles (reduction axis last).
    stats_cost = pl.CostEstimate(
        flops=int(3 * b * n * c),
        transcendentals=int(b * _NUM_GROUPS),
        bytes_accessed=int(itemsize * b * n * c),
    )
    mean_c, inv_c = pl.pallas_call(
        functools.partial(_gn_stats_kernel, denom=float(n * group_size)),
        out_shape=(jax.ShapeDtypeStruct((b, 1, c), jnp.float32),
                   jax.ShapeDtypeStruct((b, 1, c), jnp.float32)),
        grid_spec=pltpu.PrefetchScalarGridSpec(
            num_scalar_prefetch=0,
            grid=(b, n // tm),
            in_specs=[
                pl.BlockSpec((1, tm, c), lambda bi, ri: (bi, ri, 0)),
                pl.BlockSpec((c, _NUM_GROUPS), lambda bi, ri: (0, 0)),
                pl.BlockSpec((_NUM_GROUPS, c), lambda bi, ri: (0, 0)),
            ],
            out_specs=(pl.BlockSpec((1, 1, c), lambda bi, ri: (bi, 0, 0)),
                       pl.BlockSpec((1, 1, c), lambda bi, ri: (bi, 0, 0))),
        ),
        compiler_params=pltpu.CompilerParams(
            dimension_semantics=("parallel", "arbitrary"),
            vmem_limit_bytes=vmem_limit),
        cost_estimate=stats_cost,
    )(x_flat, g_mat, gt_mat)

    # Pass 2: normalize + fused QKV projection (bf16 intermediates -> half HBM).
    qkv_cost = pl.CostEstimate(
        flops=int(b * (2 * n * c * 3 * c + 8 * n * c)),
        transcendentals=0,
        bytes_accessed=int(itemsize * b * n * c + mxu_itemsize * 3 * b * n * c
                           + mxu_itemsize * 3 * c * c),
    )
    q, k, v = pl.pallas_call(
        _norm_qkv_kernel,
        out_shape=(jax.ShapeDtypeStruct((b, n, c), mxu_dtype),
                   jax.ShapeDtypeStruct((b, n, c), mxu_dtype),
                   jax.ShapeDtypeStruct((b, n, c), mxu_dtype)),
        grid_spec=pltpu.PrefetchScalarGridSpec(
            num_scalar_prefetch=0,
            grid=(b, n // tm),
            in_specs=[
                pl.BlockSpec((1, tm, c), lambda bi, ri: (bi, ri, 0)),   # x rows
                pl.BlockSpec((1, 1, c), lambda bi, ri: (bi, 0, 0)),     # mean
                pl.BlockSpec((1, 1, c), lambda bi, ri: (bi, 0, 0)),     # rsqrt(var)
                pl.BlockSpec((1, c), lambda bi, ri: (0, 0)),            # gamma
                pl.BlockSpec((1, c), lambda bi, ri: (0, 0)),            # beta
                pl.BlockSpec((c, 3 * c), lambda bi, ri: (0, 0)),        # Wqkv
                pl.BlockSpec((1, 3 * c), lambda bi, ri: (0, 0)),        # bqkv
            ],
            out_specs=(pl.BlockSpec((1, tm, c), lambda bi, ri: (bi, ri, 0)),
                       pl.BlockSpec((1, tm, c), lambda bi, ri: (bi, ri, 0)),
                       pl.BlockSpec((1, tm, c), lambda bi, ri: (bi, ri, 0))),
        ),
        compiler_params=pltpu.CompilerParams(
            dimension_semantics=("parallel", "parallel"),
            vmem_limit_bytes=vmem_limit),
        cost_estimate=qkv_cost,
    )(x_flat, mean_c, inv_c, gamma_f, beta_f, wqkv, bqkv)

    # Pass 3: flash attention over key tiles + proj_out + residual.
    attn_cost = pl.CostEstimate(
        flops=int(b * (4 * n * n * c + 2 * n * c * c)),
        transcendentals=int(b * (n * n + n * (n // tk))),
        bytes_accessed=int(mxu_itemsize * b * (n * c + 2 * n * c * (n // tq))
                           + itemsize * 2 * b * n * c + mxu_itemsize * c * c),
    )
    out_flat = pl.pallas_call(
        _flash_attn_proj_kernel,
        out_shape=jax.ShapeDtypeStruct((b, n, c), out_dtype),
        grid_spec=pltpu.PrefetchScalarGridSpec(
            num_scalar_prefetch=0,
            grid=(b, n // tq, n // tk),
            in_specs=[
                pl.BlockSpec((1, tq, c), lambda bi, qi, ki: (bi, qi, 0)),  # q tile
                pl.BlockSpec((1, tk, c), lambda bi, qi, ki: (bi, ki, 0)),  # k tile
                pl.BlockSpec((1, tk, c), lambda bi, qi, ki: (bi, ki, 0)),  # v tile
                pl.BlockSpec((1, tq, c), lambda bi, qi, ki: (bi, qi, 0)),  # residual x
                pl.BlockSpec((c, c), lambda bi, qi, ki: (0, 0)),           # Wp
                pl.BlockSpec((1, c), lambda bi, qi, ki: (0, 0)),           # bp
            ],
            out_specs=pl.BlockSpec((1, tq, c), lambda bi, qi, ki: (bi, qi, 0)),
            scratch_shapes=[pltpu.VMEM((tq, 1), jnp.float32),
                            pltpu.VMEM((tq, 1), jnp.float32),
                            pltpu.VMEM((tq, c), jnp.float32)],
        ),
        compiler_params=pltpu.CompilerParams(
            dimension_semantics=("parallel", "parallel", "arbitrary"),
            vmem_limit_bytes=vmem_limit),
        cost_estimate=attn_cost,
    )(q, k, v, x_flat, wp_m, bp_f)
    return jnp.transpose(out_flat.reshape(b, h, w, c), (0, 3, 1, 2))


# --------------------------------------------------------------------------
# Pure-JAX reference (transcription of SpatialSelfAttention.forward).
# --------------------------------------------------------------------------
def _reference(x, gamma, beta, wq, bq, wk, bk, wv, bv, wp, bp):
    b, c, h, w = x.shape
    gs = c // _NUM_GROUPS
    xg = x.reshape(b, _NUM_GROUPS, gs, h, w).astype(jnp.float32)
    mean = xg.mean(axis=(2, 3, 4), keepdims=True)
    var = xg.var(axis=(2, 3, 4), keepdims=True)
    hn = (xg - mean) * jax.lax.rsqrt(var + _EPS)
    hn = hn.reshape(b, c, h, w) * gamma.reshape(1, c, 1, 1) + beta.reshape(1, c, 1, 1)

    def conv1x1(t, wgt, bias):   # weights stored (in, out)
        return jnp.einsum('bihw,io->bohw', t, wgt) + bias.reshape(1, c, 1, 1)

    q = conv1x1(hn, wq, bq)
    k = conv1x1(hn, wk, bk)
    v = conv1x1(hn, wv, bv)
    n = h * w
    q2 = q.reshape(b, c, n).transpose(0, 2, 1)            # (b, n, c)
    k2 = k.reshape(b, c, n)                               # (b, c, n)
    att = jnp.einsum('bij,bjk->bik', q2, k2) * (float(c) ** -0.5)
    att = jax.nn.softmax(att, axis=2)
    v2 = v.reshape(b, c, n)
    h_ = jnp.einsum('bij,bjk->bik', v2, att.transpose(0, 2, 1))
    h_ = h_.reshape(b, c, h, w)
    h_ = conv1x1(h_, wp, bp)
    return x + h_


if __name__ == "__main__":
    key = jax.random.PRNGKey(0)

    def make_params(c, k):
        ks = jax.random.split(k, 10)
        gamma = 1.0 + 0.05 * jax.random.normal(ks[0], (1, c), jnp.float32)
        beta = 0.05 * jax.random.normal(ks[1], (1, c), jnp.float32)

        def lin_w(kk):
            return jax.random.normal(kk, (c, c), jnp.float32) / jnp.sqrt(c)

        wq = lin_w(ks[2]); bq = 0.01 * jax.random.normal(ks[3], (1, c), jnp.float32)
        wk = lin_w(ks[4]); bk = 0.01 * jax.random.normal(ks[5], (1, c), jnp.float32)
        wv = lin_w(ks[6]); bv = 0.01 * jax.random.normal(ks[7], (1, c), jnp.float32)
        wp = lin_w(ks[8]); bp = 0.01 * jax.random.normal(ks[9], (1, c), jnp.float32)
        return gamma, beta, wq, bq, wk, bk, wv, bv, wp, bp

    def errs(a, b_):
        d = jnp.abs(a.astype(jnp.float32) - b_.astype(jnp.float32))
        return float(jnp.max(d)), float(jnp.mean(d))

    # --- Case 1: small map (N=64) -> fully fused single-kernel path ---
    k0, k1, k2 = jax.random.split(key, 3)
    b, c, h, w = 2, 128, 8, 8
    x = jax.random.normal(k0, (b, c, h, w), jnp.float32)
    params = make_params(c, k1)
    y_ref = _reference(x, *params)

    y_bf16 = jax.block_until_ready(spatial_self_attention(x, *params))   # bf16 MXU
    assert y_bf16.shape == (b, c, h, w)
    mx, mn = errs(y_bf16, y_ref)
    assert mx < 0.25 and mn < 0.05, f"fused bf16 mismatch: max={mx} mean={mn}"

    # f32-operand variant: tight check of the kernel logic itself.
    y_f32 = jax.block_until_ready(
        spatial_self_attention(x, *params, mxu_dtype=jnp.float32))
    mx, mn = errs(y_f32, y_ref)
    assert mx < 2e-2, f"fused f32 mismatch: max={mx} mean={mn}"

    # --- Case 2: larger map (N=1024) -> tiled two-pass GN + flash attention ---
    b2, c2, h2, w2 = 1, 128, 32, 32
    x2 = jax.random.normal(k2, (b2, c2, h2, w2), jnp.float32)
    params2 = make_params(c2, jax.random.fold_in(k1, 7))
    y2 = jax.block_until_ready(
        spatial_self_attention(x2, *params2, fused_n_max=0))   # force tiled path
    y2_ref = _reference(x2, *params2)
    assert y2.shape == (b2, c2, h2, w2)
    mx, mn = errs(y2, y2_ref)
    assert mx < 0.25 and mn < 0.05, f"tiled bf16 mismatch: max={mx} mean={mn}"

    print("KERNEL_OK")
</pallas_src>

<mosaic_0001>
module attributes {stable_mosaic.version = 11 : i64} {
  func.func @_fused_gn_attn_kernel(%arg0: i32, %arg1: memref<1x64x128xf32, #tpu.memory_space<vmem>>, %arg2: memref<128x32xf32, #tpu.memory_space<vmem>>, %arg3: memref<32x128xf32, #tpu.memory_space<vmem>>, %arg4: memref<1x128xf32, #tpu.memory_space<vmem>>, %arg5: memref<1x128xf32, #tpu.memory_space<vmem>>, %arg6: memref<128x384xbf16, #tpu.memory_space<vmem>>, %arg7: memref<1x384xf32, #tpu.memory_space<vmem>>, %arg8: memref<128x128xbf16, #tpu.memory_space<vmem>>, %arg9: memref<1x128xf32, #tpu.memory_space<vmem>>, %arg10: memref<1x64x128xf32, #tpu.memory_space<vmem>>) attributes {dimension_semantics = [#tpu.dimension_semantics<parallel>], iteration_bounds = array<i64: 2>, scalar_prefetch = 0 : i64, scratch_operands = 0 : i64, tpu.core_type = #tpu.core_type<tc>, window_params = [{transform_indices = @transform_0, window_bounds = array<i64: 1, 64, 128>}, {pipeline_mode = #tpu.pipeline_mode<synchronous>, transform_indices = @transform_1, window_bounds = array<i64: 128, 32>}, {pipeline_mode = #tpu.pipeline_mode<synchronous>, transform_indices = @transform_2, window_bounds = array<i64: 32, 128>}, {pipeline_mode = #tpu.pipeline_mode<synchronous>, transform_indices = @transform_3, window_bounds = array<i64: 1, 128>}, {pipeline_mode = #tpu.pipeline_mode<synchronous>, transform_indices = @transform_4, window_bounds = array<i64: 1, 128>}, {pipeline_mode = #tpu.pipeline_mode<synchronous>, transform_indices = @transform_5, window_bounds = array<i64: 128, 384>}, {pipeline_mode = #tpu.pipeline_mode<synchronous>, transform_indices = @transform_6, window_bounds = array<i64: 1, 384>}, {pipeline_mode = #tpu.pipeline_mode<synchronous>, transform_indices = @transform_7, window_bounds = array<i64: 128, 128>}, {pipeline_mode = #tpu.pipeline_mode<synchronous>, transform_indices = @transform_8, window_bounds = array<i64: 1, 128>}, {transform_indices = @transform_9, window_bounds = array<i64: 1, 64, 128>}]} {
    %c0 = arith.constant 0 : index
    %c0_0 = arith.constant 0 : index
    %c0_1 = arith.constant 0 : index
    %0 = vector.load %arg1[%c0, %c0_0, %c0_1] : memref<1x64x128xf32, #tpu.memory_space<vmem>>, vector<1x64x128xf32>
    %1 = vector.shape_cast %0 : vector<1x64x128xf32> to vector<64x128xf32>
    %cst = arith.constant dense<0.000000e+00> : vector<128xf32>
    %2 = vector.multi_reduction <add>, %1, %cst [0] : vector<64x128xf32> to vector<128xf32>
    %3 = vector.shape_cast %2 : vector<128xf32> to vector<1x128xf32>
    %4 = arith.mulf %1, %1 : vector<64x128xf32>
    %cst_2 = arith.constant dense<0.000000e+00> : vector<128xf32>
    %5 = vector.multi_reduction <add>, %4, %cst_2 [0] : vector<64x128xf32> to vector<128xf32>
    %6 = vector.shape_cast %5 : vector<128xf32> to vector<1x128xf32>
    %c0_3 = arith.constant 0 : index
    %c0_4 = arith.constant 0 : index
    %7 = vector.load %arg2[%c0_3, %c0_4] : memref<128x32xf32, #tpu.memory_space<vmem>>, vector<128x32xf32>
    %cst_5 = arith.constant dense<0.000000e+00> : vector<1x32xf32>
    %8 = tpu.matmul %3, %7, %cst_5 {dimension_numbers = #tpu.dot_dimension_numbers<[1], [0], [0], [1], [0, 0, 1, 1], [], []>} : vector<1x128xf32>, vector<128x32xf32>, vector<1x32xf32> -> vector<1x32xf32>
    %c0_6 = arith.constant 0 : index
    %c0_7 = arith.constant 0 : index
    %9 = vector.load %arg2[%c0_6, %c0_7] : memref<128x32xf32, #tpu.memory_space<vmem>>, vector<128x32xf32>
    %cst_8 = arith.constant dense<0.000000e+00> : vector<1x32xf32>
    %10 = tpu.matmul %6, %9, %cst_8 {dimension_numbers = #tpu.dot_dimension_numbers<[1], [0], [0], [1], [0, 0, 1, 1], [], []>} : vector<1x128xf32>, vector<128x32xf32>, vector<1x32xf32> -> vector<1x32xf32>
    %cst_9 = arith.constant 2.560000e+02 : f32
    %11 = vector.broadcast %cst_9 : f32 to vector<1x32xf32>
    %12 = arith.divf %8, %11 : vector<1x32xf32>
    %cst_10 = arith.constant 2.560000e+02 : f32
    %13 = vector.broadcast %cst_10 : f32 to vector<1x32xf32>
    %14 = arith.divf %10, %13 : vector<1x32xf32>
    %15 = arith.mulf %12, %12 : vector<1x32xf32>
    %16 = arith.subf %14, %15 : vector<1x32xf32>
    %cst_11 = arith.constant 0.000000e+00 : f32
    %17 = vector.broadcast %cst_11 : f32 to vector<1x32xf32>
    %18 = arith.maximumf %16, %17 : vector<1x32xf32>
    %cst_12 = arith.constant 9.99999997E-7 : f32
    %19 = vector.broadcast %cst_12 : f32 to vector<1x32xf32>
    %20 = arith.addf %18, %19 : vector<1x32xf32>
    %21 = math.rsqrt %20 : vector<1x32xf32>
    %c0_13 = arith.constant 0 : index
    %c0_14 = arith.constant 0 : index
    %22 = vector.load %arg3[%c0_13, %c0_14] : memref<32x128xf32, #tpu.memory_space<vmem>>, vector<32x128xf32>
    %cst_15 = arith.constant dense<0.000000e+00> : vector<1x128xf32>
    %23 = tpu.matmul %12, %22, %cst_15 {dimension_numbers = #tpu.dot_dimension_numbers<[1], [0], [0], [1], [0, 0, 1, 1], [], []>} : vector<1x32xf32>, vector<32x128xf32>, vector<1x128xf32> -> vector<1x128xf32>
    %c0_16 = arith.constant 0 : index
    %c0_17 = arith.constant 0 : index
    %24 = vector.load %arg3[%c0_16, %c0_17] : memref<32x128xf32, #tpu.memory_space<vmem>>, vector<32x128xf32>
    %cst_18 = arith.constant dense<0.000000e+00> : vector<1x128xf32>
    %25 = tpu.matmul %21, %24, %cst_18 {dimension_numbers = #tpu.dot_dimension_numbers<[1], [0], [0], [1], [0, 0, 1, 1], [], []>} : vector<1x32xf32>, vector<32x128xf32>, vector<1x128xf32> -> vector<1x128xf32>
    %26 = vector.broadcast %23 : vector<1x128xf32> to vector<64x128xf32>
    %27 = arith.subf %1, %26 : vector<64x128xf32>
    %28 = vector.broadcast %25 : vector<1x128xf32> to vector<64x128xf32>
    %29 = arith.mulf %27, %28 : vector<64x128xf32>
    %c0_19 = arith.constant 0 : index
    %c0_20 = arith.constant 0 : index
    %30 = vector.load %arg4[%c0_19, %c0_20] : memref<1x128xf32, #tpu.memory_space<vmem>>, vector<1x128xf32>
    %31 = vector.broadcast %30 : vector<1x128xf32> to vector<64x128xf32>
    %32 = arith.mulf %29, %31 : vector<64x128xf32>
    %c0_21 = arith.constant 0 : index
    %c0_22 = arith.constant 0 : index
    %33 = vector.load %arg5[%c0_21, %c0_22] : memref<1x128xf32, #tpu.memory_space<vmem>>, vector<1x128xf32>
    %34 = vector.broadcast %33 : vector<1x128xf32> to vector<64x128xf32>
    %35 = arith.addf %32, %34 : vector<64x128xf32>
    %36 = arith.truncf %35 : vector<64x128xf32> to vector<64x128xbf16>
    %c0_23 = arith.constant 0 : index
    %c0_24 = arith.constant 0 : index
    %37 = vector.load %arg6[%c0_23, %c0_24] : memref<128x384xbf16, #tpu.memory_space<vmem>>, vector<128x384xbf16>
    %cst_25 = arith.constant dense<0.000000e+00> : vector<64x384xf32>
    %38 = tpu.matmul %36, %37, %cst_25 {dimension_numbers = #tpu.dot_dimension_numbers<[1], [0], [0], [1], [0, 0, 1, 1], [], []>} : vector<64x128xbf16>, vector<128x384xbf16>, vector<64x384xf32> -> vector<64x384xf32>
    %c0_26 = arith.constant 0 : index
    %c0_27 = arith.constant 0 : index
    %39 = vector.load %arg7[%c0_26, %c0_27] : memref<1x384xf32, #tpu.memory_space<vmem>>, vector<1x384xf32>
    %40 = vector.broadcast %39 : vector<1x384xf32> to vector<64x384xf32>
    %41 = arith.addf %38, %40 : vector<64x384xf32>
    %42 = vector.extract_strided_slice %41 {offsets = [0, 0], sizes = [64, 128], strides = [1, 1]} : vector<64x384xf32> to vector<64x128xf32>
    %43 = arith.truncf %42 : vector<64x128xf32> to vector<64x128xbf16>
    %44 = vector.extract_strided_slice %41 {offsets = [0, 128], sizes = [64, 128], strides = [1, 1]} : vector<64x384xf32> to vector<64x128xf32>
    %45 = arith.truncf %44 : vector<64x128xf32> to vector<64x128xbf16>
    %46 = vector.extract_strided_slice %41 {offsets = [0, 256], sizes = [64, 128], strides = [1, 1]} : vector<64x384xf32> to vector<64x128xf32>
    %47 = arith.truncf %46 : vector<64x128xf32> to vector<64x128xbf16>
    %cst_28 = arith.constant dense<0.000000e+00> : vector<64x64xf32>
    %48 = tpu.matmul %43, %45, %cst_28 {dimension_numbers = #tpu.dot_dimension_numbers<[1], [1], [0], [0], [0, 0, 1, 0], [], []>} : vector<64x128xbf16>, vector<64x128xbf16>, vector<64x64xf32> -> vector<64x64xf32>
    %cst_29 = arith.constant dense<0xFF800000> : vector<64xf32>
    %49 = vector.multi_reduction <maximumf>, %48, %cst_29 [1] : vector<64x64xf32> to vector<64xf32>
    %50 = vector.shape_cast %49 : vector<64xf32> to vector<64x1xf32>
    %51 = vector.broadcast %50 : vector<64x1xf32> to vector<64x64xf32>
    %52 = arith.subf %48, %51 : vector<64x64xf32>
    %53 = math.exp %52 : vector<64x64xf32>
    %cst_30 = arith.constant dense<0.000000e+00> : vector<64xf32>
    %54 = vector.multi_reduction <add>, %53, %cst_30 [1] : vector<64x64xf32> to vector<64xf32>
    %55 = vector.shape_cast %54 : vector<64xf32> to vector<64x1xf32>
    %56 = arith.truncf %53 : vector<64x64xf32> to vector<64x64xbf16>
    %cst_31 = arith.constant dense<0.000000e+00> : vector<64x128xf32>
    %57 = tpu.matmul %56, %47, %cst_31 {dimension_numbers = #tpu.dot_dimension_numbers<[1], [0], [0], [1], [0, 0, 1, 1], [], []>} : vector<64x64xbf16>, vector<64x128xbf16>, vector<64x128xf32> -> vector<64x128xf32>
    %58 = tpu.reciprocal %55 {approx = true} : vector<64x1xf32> -> vector<64x1xf32>
    %59 = vector.broadcast %58 : vector<64x1xf32> to vector<64x128xf32>
    %60 = arith.mulf %57, %59 : vector<64x128xf32>
    %61 = arith.truncf %60 : vector<64x128xf32> to vector<64x128xbf16>
    %c0_32 = arith.constant 0 : index
    %c0_33 = arith.constant 0 : index
    %62 = vector.load %arg8[%c0_32, %c0_33] : memref<128x128xbf16, #tpu.memory_space<vmem>>, vector<128x128xbf16>
    %cst_34 = arith.constant dense<0.000000e+00> : vector<64x128xf32>
    %63 = tpu.matmul %61, %62, %cst_34 {dimension_numbers = #tpu.dot_dimension_numbers<[1], [0], [0], [1], [0, 0, 1, 1], [], []>} : vector<64x128xbf16>, vector<128x128xbf16>, vector<64x128xf32> -> vector<64x128xf32>
    %c0_35 = arith.constant 0 : index
    %c0_36 = arith.constant 0 : index
    %64 = vector.load %arg9[%c0_35, %c0_36] : memref<1x128xf32, #tpu.memory_space<vmem>>, vector<1x128xf32>
    %65 = vector.broadcast %64 : vector<1x128xf32> to vector<64x128xf32>
    %66 = arith.addf %63, %65 : vector<64x128xf32>
    %c0_37 = arith.constant 0 : index
    %c0_38 = arith.constant 0 : index
    %c0_39 = arith.constant 0 : index
    %67 = vector.load %arg1[%c0_37, %c0_38, %c0_39] : memref<1x64x128xf32, #tpu.memory_space<vmem>>, vector<1x64x128xf32>
    %68 = vector.shape_cast %67 : vector<1x64x128xf32> to vector<64x128xf32>
    %69 = arith.addf %68, %66 : vector<64x128xf32>
    %c0_40 = arith.constant 0 : index
    %c0_41 = arith.constant 0 : index
    %c0_42 = arith.constant 0 : index
    %70 = vector.load %arg10[%c0_40, %c0_41, %c0_42] : memref<1x64x128xf32, #tpu.memory_space<vmem>>, vector<1x64x128xf32>
    %71 = vector.shape_cast %70 : vector<1x64x128xf32> to vector<64x128xf32>
    %72 = vector.shape_cast %69 : vector<64x128xf32> to vector<1x64x128xf32>
    tpu.vector_store %arg10[%c0_40, %c0_41, %c0_42], %72 {strides = array<i32>} : memref<1x64x128xf32, #tpu.memory_space<vmem>>, vector<1x64x128xf32>,
    return
  }
  func.func @transform_0(%arg0: i32) -> (i32, i32, i32) {
    %c0_i32 = arith.constant 0 : i32
    %c0_i32_0 = arith.constant 0 : i32
    %c0_i32_1 = arith.constant 0 : i32
    return %arg0, %c0_i32, %c0_i32_0 : i32, i32, i32
  }
  func.func @transform_1(%arg0: i32) -> (i32, i32) {
    %c0_i32 = arith.constant 0 : i32
    %c0_i32_0 = arith.constant 0 : i32
    %c0_i32_1 = arith.constant 0 : i32
    return %c0_i32, %c0_i32_0 : i32, i32
  }
  func.func @transform_2(%arg0: i32) -> (i32, i32) {
    %c0_i32 = arith.constant 0 : i32
    %c0_i32_0 = arith.constant 0 : i32
    %c0_i32_1 = arith.constant 0 : i32
    return %c0_i32, %c0_i32_0 : i32, i32
  }
  func.func @transform_3(%arg0: i32) -> (i32, i32) {
    %c0_i32 = arith.constant 0 : i32
    %c0_i32_0 = arith.constant 0 : i32
    %c0_i32_1 = arith.constant 0 : i32
    return %c0_i32, %c0_i32_0 : i32, i32
  }
  func.func @transform_4(%arg0: i32) -> (i32, i32) {
    %c0_i32 = arith.constant 0 : i32
    %c0_i32_0 = arith.constant 0 : i32
    %c0_i32_1 = arith.constant 0 : i32
    return %c0_i32, %c0_i32_0 : i32, i32
  }
  func.func @transform_5(%arg0: i32) -> (i32, i32) {
    %c0_i32 = arith.constant 0 : i32
    %c0_i32_0 = arith.constant 0 : i32
    %c0_i32_1 = arith.constant 0 : i32
    return %c0_i32, %c0_i32_0 : i32, i32
  }
  func.func @transform_6(%arg0: i32) -> (i32, i32) {
    %c0_i32 = arith.constant 0 : i32
    %c0_i32_0 = arith.constant 0 : i32
    %c0_i32_1 = arith.constant 0 : i32
    return %c0_i32, %c0_i32_0 : i32, i32
  }
  func.func @transform_7(%arg0: i32) -> (i32, i32) {
    %c0_i32 = arith.constant 0 : i32
    %c0_i32_0 = arith.constant 0 : i32
    %c0_i32_1 = arith.constant 0 : i32
    return %c0_i32, %c0_i32_0 : i32, i32
  }
  func.func @transform_8(%arg0: i32) -> (i32, i32) {
    %c0_i32 = arith.constant 0 : i32
    %c0_i32_0 = arith.constant 0 : i32
    %c0_i32_1 = arith.constant 0 : i32
    return %c0_i32, %c0_i32_0 : i32, i32
  }
  func.func @transform_9(%arg0: i32) -> (i32, i32, i32) {
    %c0_i32 = arith.constant 0 : i32
    %c0_i32_0 = arith.constant 0 : i32
    %c0_i32_1 = arith.constant 0 : i32
    return %arg0, %c0_i32, %c0_i32_0 : i32, i32, i32
  }
}

</mosaic_0001>

<bundles_post_ra>
// kernel: spatial_self_attention.1
= control target key start
LH: loop header
LB: loop body
LE: loop exit
PB: predicated region body
PF: predicated region fallthrough
CT: control target
= control target key end

     0   :  { %14 = vsyncpa [#allocation3], 0  ;;  %s2535_s0 = inlined_call_operand.vmem [shape: f32[2,64,128], index: 0, kind: input, shape index: {}]   ;;  %s2536_s1 = inlined_call_operand.vmem [shape: f32[128,32], index: 1, kind: input, shape index: {}]   ;;  %s2537_s2 = inlined_call_operand.vmem [shape: f32[32,128], index: 2, kind: input, shape index: {}]   ;;  %s2538_s3 = inlined_call_operand.vmem [shape: f32[1,128], index: 3, kind: input, shape index: {}]   ;;  %s2539_s4 = inlined_call_operand.vmem [shape: f32[1,128], index: 4, kind: input, shape index: {}]   ;;  %s2540_s5 = inlined_call_operand.vmem [shape: bf16[128,384], index: 5, kind: input, shape index: {}]   ;;  %s2541_s6 = inlined_call_operand.vmem [shape: f32[1,384], index: 6, kind: input, shape index: {}]   ;;  %s2542_s7 = inlined_call_operand.vmem [shape: bf16[128,128], index: 7, kind: input, shape index: {}]   ;;  %s2543_s8 = inlined_call_operand.vmem [shape: f32[1,128], index: 8, kind: input, shape index: {}]   ;;  %s2544_s9 = inlined_call_operand.hbm [shape: f32[2,64,128], index: 9, kind: output, shape index: {}]  }
   0x1   :  { %16 = vsyncpa [#allocation3 + $0x1], 0  ;;  %s2096_s30 = smov 0   ;;  %s2098_s10 = smov 0  }
   0x2   :  { %s2100_s11 = smov 0   ;;  %s2102_s12 = smov 0  }
   0x3 LB: > { %s2117_s13 = sadd.s32 4294967295, %s2038_s12   ;;  %s1541_s14 = sadd.s32 4294967294, %s2038_s12   ;;  %s2038_s12 = sphi %s2102_s12, %s2550_s12   ;;  %s2034_s11 = sphi %s2100_s11, %s2549_s11   ;;  %s2030_s10 = sphi %s2098_s10, %s2548_s10   ;;  %s2026_s30 = sphi %s2096_s30, %s2547_s30  }
   0x4   : > { %s2121_s15 = sadd.s32 1, %s2038_s12   ;;  %s223_s16 = sadd.s32 1, %s2034_s11 }
   0x5   : > { %s220_s17 = ssub.s32 %s2038_s12, %s2121_s15  ;;  %p233_p0 = scmp.ne.s32.totalorder %s2034_s11, %s2030_s10 }
   0x6   : > { %p221_p1 = scmp.eq.s32.totalorder %s220_s17, 0  ;;  %p234_p2 = scmp.eq.s32.totalorder %s2117_s13, 1 }
   0x7   : > { %p239_p3 = scmp.ne.s32.totalorder %s2030_s10, %s2026_s30  ;;  %p240_p4 = scmp.eq.s32.totalorder %s1541_s14, 1 }
   0x8   : > { %s2132_s18 = scalar_select %p221_p1, %s2034_s11, %s223_s16  }
   0x9   : > { %p2134_p5 = por %p234_p2, %p233_p0  ;;  %p2138_p6 = por %p240_p4, %p239_p3 }
   0xa   : > { %p1544_p7 = scmp.ge.s32.totalorder %s2038_s12, 1  ;;  %p290_p8 = scmp.lt.s32.totalorder %s2038_s12, 3 }
   0xc   : > { %p291_p9 = pnand %p1544_p7, %p290_p8 }
   0xd   : > { %p326_p10 = scmp.lt.s32.totalorder (!%p291_p9), %s2117_s13, 1  ;;  %s1595_s14 = sshll.u32 (!%p291_p9), %s2117_s13, 10 }
   0xe   : > { %294 = sbr.rel (%p291_p9) target bundleno = 1523 (0x5f3), region = 56  ;;  %s2486_s23 = scalar_lea.hbm (!%p291_p9), %s2544_s9, %s1595_s14 }
   0xf   : > { %s2043_s26 = smov (!%p291_p9), [#allocation2]  }
  0x10   : > { %s1982_s27 = sshll.u32 (!%p291_p9), %s2043_s26, 4  ;;  %s1983_s27 = int_to_ptr.vmem [resolvable:$false] %s1982_s27 }
  0x13   : > { %v389_v0 = vld [vmem:[%s2536_s1 + $0x78] sm:$0xff]  ;;  %v2040_v1 = vmov 0.0   ;;  %v388_v2 = vld [vmem:[%s2536_s1 + $0x70] sm:$0xff]  ;;  %s327_s25 = scalar_select %p326_p10, %s2117_s13, 1  ;;  %v387_v3 = vld [vmem:[%s2536_s1 + $0x68] sm:$0xff]  ;;  %vm2041_vm0 = vmmov 0  }
  0x14   : > { %1680 = vmatprep.subr.mxu0 %v2040_v1  ;;  %1715 = vmatprep.subr.mxu1 %v2040_v1  ;;  %v386_v4 = vld [vmem:[%s2536_s1 + $0x60] sm:$0xff]  ;;  %v385_v8 = vld [vmem:[%s2536_s1 + $0x58] sm:$0xff]  ;;  %v384_v13 = vld [vmem:[%s2536_s1 + $0x50] sm:$0xff]  ;;  %vm542_vm1 = vcmask 261120   ;;  %vm1139_vm2 = vcmask 523264  }
  0x15   : > { %1681 = vmatpush3.msra.mxu0 %v389_v0  ;;  %1716 = vmatpush3.msra.mxu1 %v389_v0  ;;  %s1594_s28 = sshll.u32 %s327_s25, 6  ;;  %v383_v16 = vld [vmem:[%s2536_s1 + $0x48] sm:$0xff]  ;;  %v382_v21 = vld [vmem:[%s2536_s1 + $0x40] sm:$0xff]  ;;  %v381_v26 = vld [vmem:[%s2536_s1 + $0x38] sm:$0xff]  ;;  %s323_s25 = sand.u32 1, %s2030_s10  }
  0x16   : > { %1682 = vmatprep.subr.mxu0 %v2040_v1  ;;  %1717 = vmatprep.subr.mxu1 %v2040_v1  ;;  %s2167_s21 = scalar_lea.vmem %s2535_s0, %s1594_s28  ;;  %v380_v31 = vld [vmem:[%s2536_s1 + $0x30] sm:$0xff]  ;;  %v379_v35 = vld [vmem:[%s2536_s1 + $0x28] sm:$0xff]  ;;  %v378_v39 = vld [vmem:[%s2536_s1 + $0x20] sm:$0xff]  ;;  %s1545_s28 = sshll.u32 %s323_s25, 6 }
  0x17   : > { %1683 = vmatpush3.msra.mxu0 %v388_v2  ;;  %1718 = vmatpush3.msra.mxu1 %v388_v2  ;;  %v2170_v5 = vld [vmem:[%s2167_s21] sm:$0xff]  ;;  %v2173_v6 = vld [vmem:[%s2167_s21 + $0x8] sm:$0xff]  ;;  %v2176_v7 = vld [vmem:[%s2167_s21 + $0x10] sm:$0xff]  ;;  %s2467_s29 = scalar_lea.vmem [#allocation2], %s1545_s28  ;;  %s2495_s13 = scalar_lea.sflag [#allocation3], %s323_s25 }
  0x18   : > { %1684 = vmatprep.subr.mxu0 %v2040_v1  ;;  %1719 = vmatprep.subr.mxu1 %v2040_v1  ;;  %v2184_v9 = vld [vmem:[%s2167_s21 + $0x18] sm:$0xff]  ;;  %v340_v10 = vadd.f32 %v2173_v6, %v2170_v5  ;;  %v353_v11 = vmul.f32 %v2170_v5, %v2170_v5  ;;  %v354_v12 = vmul.f32 %v2173_v6, %v2173_v6  ;;  %v2196_v14 = vld [vmem:[%s2167_s21 + $0x20] sm:$0xff]  ;;  %v2206_v17 = vld [vmem:[%s2167_s21 + $0x28] sm:$0xff]  ;;  %s1479_s16 = sshll.u32 %s2467_s29, 4  ;;  %s1984_s28 = scalar_lea.vmem %s1983_s27, 2048  ;;  %s2488_s16 = int_to_ptr.vmem [resolvable:$true] %s1479_s16 }
  0x19   : > { %1685 = vmatpush3.msra.mxu0 %v387_v3  ;;  %1720 = vmatpush3.msra.mxu1 %v387_v3  ;;  %v355_v15 = vmul.f32 %v2176_v7, %v2176_v7  ;;  %v356_v19 = vmul.f32 %v2184_v9, %v2184_v9  ;;  %v2217_v22 = vld [vmem:[%s2167_s21 + $0x30] sm:$0xff]  ;;  %v357_v24 = vmul.f32 %v2196_v14, %v2196_v14  ;;  %v2228_v27 = vld [vmem:[%s2167_s21 + $0x38] sm:$0xff]  ;;  %v375_v50 = vld [vmem:[%s2536_s1 + $0x8] sm:$0xff]  ;;  %s1978_s24 = scalar_lea.vmem %s2488_s16, 1024  ;;  %p1985_p0 = scmp.lt.s32.totalorder %s2488_s16, %s1983_s27 }
  0x1a   : > { %1686 = vmatprep.subr.mxu0 %v2040_v1  ;;  %1721 = vmatprep.subr.mxu1 %v2040_v1  ;;  %v341_v18 = vadd.f32 %v340_v10, %v2176_v7  ;;  %v361_v20 = vadd.f32 %v354_v12, %v353_v11  ;;  %v358_v29 = vmul.f32 %v2206_v17, %v2206_v17  ;;  %v377_v42 = vld [vmem:[%s2536_s1 + $0x18] sm:$0xff]  ;;  %v376_v47 = vld [vmem:[%s2536_s1 + $0x10] sm:$0xff]  ;;  %v374_v53 = vld [vmem:[%s2536_s1] sm:$0xff]  ;;  %p1979_p11 = scmp.ne.s32.totalorder %s2488_s16, %s1978_s24  ;;  %p1986_p1 = scmp.lt.s32.totalorder %s1984_s28, %s1978_s24 }
  0x1b   : > { %1687 = vmatpush3.msra.mxu0 %v386_v4  ;;  %1722 = vmatpush3.msra.mxu1 %v386_v4  ;;  %v359_v33 = vmul.f32 %v2217_v22, %v2217_v22  ;;  %v360_v37 = vmul.f32 %v2228_v27, %v2228_v27  ;;  %v541_v58 = vld [vmem:[%s2537_s2 + $0x18] sm:$0xff]  ;;  %v540_v60 = vld [vmem:[%s2537_s2 + $0x10] sm:$0xff]  ;;  %v539_v61 = vld [vmem:[%s2537_s2 + $0x8] sm:$0xff] }
  0x1c   : > { %1688 = vmatprep.subr.mxu0 %v2040_v1  ;;  %1723 = vmatprep.subr.mxu1 %v2040_v1  ;;  %v342_v23 = vadd.f32 %v341_v18, %v2184_v9  ;;  %v362_v25 = vadd.f32 %v361_v20, %v355_v15  ;;  %v538_v62 = vld [vmem:[%s2537_s2] sm:$0xff]  ;;  %v1896_v18 = vld [vmem:[%s2540_s5 + $0xa8] ss:$12 sps:$4 sm:$0xff]   ;;  %v1900_v20 = vld [vmem:[%s2540_s5 + $0x90] ss:$12 sps:$4 sm:$0xff]   ;;  %p1980_p12 = pnand %p1979_p11, %p2134_p5  ;;  %p1987_p2 = por %p1986_p1, %p1985_p0 }
  0x1d   : > { %1689 = vmatpush3.msra.mxu0 %v385_v8  ;;  %1724 = vmatpush3.msra.mxu1 %v385_v8 }
  0x1e   : > { %1690 = vmatprep.subr.mxu0 %v2040_v1  ;;  %1725 = vmatprep.subr.mxu1 %v2040_v1  ;;  %v343_v28 = vadd.f32 %v342_v23, %v2196_v14  ;;  %v363_v30 = vadd.f32 %v362_v25, %v356_v19  ;;  %v1899_v19 = vld [vmem:[%s2540_s5 + $0xb0] ss:$12 sps:$4 sm:$0xff]   ;;  %v1904_v25 = vld [vmem:[%s2540_s5 + $0x78] ss:$12 sps:$4 sm:$0xff]   ;;  %p1981_p13 = pneg %p1980_p12 }
  0x1f   : > { %1691 = vmatpush3.msra.mxu0 %v384_v13  ;;  %1726 = vmatpush3.msra.mxu1 %v384_v13  ;;  %v1906_v23 = vld [vmem:[%s2540_s5 + $0x7c] ss:$12 sps:$4 sm:$0xff]  }
  0x20   : > { %1692 = vmatprep.subr.mxu0 %v2040_v1  ;;  %1727 = vmatprep.subr.mxu1 %v2040_v1  ;;  %v344_v32 = vadd.f32 %v343_v28, %v2206_v17  ;;  %v364_v34 = vadd.f32 %v363_v30, %v357_v24  ;;  %v1907_v24 = vld [vmem:[%s2540_s5 + $0x80] ss:$12 sps:$4 sm:$0xff]   ;;  %v1911_v28 = vld [vmem:[%s2540_s5 + $0x68] ss:$12 sps:$4 sm:$0xff]   ;;  %p1988_p3 = pnand %p1987_p2, %p1981_p13 }
  0x21   : > { %1693 = vmatpush3.msra.mxu0 %v383_v16  ;;  %1728 = vmatpush3.msra.mxu1 %v383_v16  ;;  %v1898_v16 = vld [vmem:[%s2540_s5 + $0xac] ss:$12 sps:$4 sm:$0xff]  }
  0x22   : > { %1694 = vmatprep.subr.mxu0 %v2040_v1  ;;  %1729 = vmatprep.subr.mxu1 %v2040_v1  ;;  %v345_v36 = vadd.f32 %v344_v32, %v2217_v22  ;;  %v365_v38 = vadd.f32 %v364_v34, %v358_v29  ;;  %v1908_v29 = vld [vmem:[%s2540_s5 + $0x60] ss:$12 sps:$4 sm:$0xff]   ;;  %v1912_v32 = vld [vmem:[%s2540_s5 + $0x48] ss:$12 sps:$4 sm:$0xff]   ;;  %v1916_v34 = vld [vmem:[%s2540_s5 + $0x30] ss:$12 sps:$4 sm:$0xff]  }
  0x23   : > { %1695 = vmatpush3.msra.mxu0 %v382_v21  ;;  %1730 = vmatpush3.msra.mxu1 %v382_v21  ;;  %v1903_v21 = vld [vmem:[%s2540_s5 + $0x98] ss:$12 sps:$4 sm:$0xff]  }
  0x24   : > { %1696 = vmatprep.subr.mxu0 %v2040_v1  ;;  %1731 = vmatprep.subr.mxu1 %v2040_v1  ;;  %v346_v40 = vadd.f32 %v345_v36, %v2228_v27  ;;  %v366_v41 = vadd.f32 %v365_v38, %v359_v33  ;;  %v1914_v30 = vld [vmem:[%s2540_s5 + $0x4c] ss:$12 sps:$4 sm:$0xff]   ;;  %v1918_v33 = vld [vmem:[%s2540_s5 + $0x34] ss:$12 sps:$4 sm:$0xff]   ;;  %v1922_v36 = vld [vmem:[%s2540_s5 + $0x1c] ss:$12 sps:$4 sm:$0xff]  }
  0x25   : > { %1697 = vmatpush3.msra.mxu0 %v381_v26  ;;  %1732 = vmatpush3.msra.mxu1 %v381_v26  ;;  %v1910_v26 = vld [vmem:[%s2540_s5 + $0x64] ss:$12 sps:$4 sm:$0xff]   ;;  %v1923_v38 = vld [vmem:[%s2540_s5 + $0x20] ss:$12 sps:$4 sm:$0xff]  }
  0x26   : > { %1698 = vmatprep.subr.mxu0 %v2040_v1  ;;  %1733 = vmatprep.subr.mxu1 %v2040_v1  ;;  %v347_v43 = vrot.slane %v346_v40, 4  ;;  %v367_v44 = vadd.f32 %v366_v41, %v360_v37  ;;  %v1920_v37 = vld [vmem:[%s2540_s5 + $0x18] ss:$12 sps:$4 sm:$0xff]   ;;  %v1924_v41 = vld [vmem:[%s2540_s5] ss:$12 sps:$4 sm:$0xff]  }
  0x27   : > { %1699 = vmatpush3.msra.mxu0 %v380_v31  ;;  %1734 = vmatpush3.msra.mxu1 %v380_v31  ;;  %v1915_v31 = vld [vmem:[%s2540_s5 + $0x50] ss:$12 sps:$4 sm:$0xff]  }
  0x28   : > { %1700 = vmatprep.subr.mxu0 %v2040_v1  ;;  %1735 = vmatprep.subr.mxu1 %v2040_v1  ;;  %v348_v45 = vadd.f32 %v347_v43, %v346_v40  ;;  %v368_v46 = vrot.slane %v367_v44, 4  ;;  %v1927_v40 = vld [vmem:[%s2540_s5 + $0x8] ss:$12 sps:$4 sm:$0xff]  }
  0x29   : > { %1701 = vmatpush3.msra.mxu0 %v379_v35  ;;  %1736 = vmatpush3.msra.mxu1 %v379_v35  ;;  %v1919_v35 = vld [vmem:[%s2540_s5 + $0x38] ss:$12 sps:$4 sm:$0xff]  }
  0x2a   : > { %1702 = vmatprep.subr.mxu0 %v2040_v1  ;;  %1737 = vmatprep.subr.mxu1 %v2040_v1  ;;  %v349_v48 = vrot.slane %v348_v45, 2  ;;  %v369_v49 = vadd.f32 %v368_v46, %v367_v44 }
  0x2b   : > { %1703 = vmatpush3.msra.mxu0 %v378_v39  ;;  %1738 = vmatpush3.msra.mxu1 %v378_v39  ;;  %v1926_v39 = vld [vmem:[%s2540_s5 + $0x4] ss:$12 sps:$4 sm:$0xff]  }
  0x2c   : > { %1704 = vmatprep.subr.mxu0 %v2040_v1  ;;  %1739 = vmatprep.subr.mxu1 %v2040_v1  ;;  %v350_v51 = vadd.f32 %v349_v48, %v348_v45  ;;  %v370_v52 = vrot.slane %v369_v49, 2  ;;  %v689_v45 = vlaneseq }
  0x2d   : > { %1705 = vmatpush3.msra.mxu0 %v377_v42  ;;  %1740 = vmatpush3.msra.mxu1 %v377_v42  ;;  %v2042_v42 = vmov 0  }
  0x2e   : > { %1706 = vmatprep.subr.mxu0 %v2040_v1  ;;  %1741 = vmatprep.subr.mxu1 %v2040_v1  ;;  %v351_v54 = vrot.slane %v350_v51, 1  ;;  %v371_v55 = vadd.f32 %v370_v52, %v369_v49  ;;  %v2381_v46 = vshrl.u32 %v689_v45, 7 }
  0x2f   : > { %1707 = vmatpush3.msra.mxu0 %v376_v47  ;;  %1742 = vmatpush3.msra.mxu1 %v376_v47 }
  0x30   : > { %1708 = vmatprep.subr.mxu0 %v2040_v1  ;;  %1743 = vmatprep.subr.mxu1 %v2040_v1  ;;  %v352_v56 = vadd.f32 %v351_v54, %v350_v51  ;;  %v372_v57 = vrot.slane %v371_v55, 1  ;;  %v691_v47 = vsub.s32 0, %v2381_v46 }
  0x31   : > { %1709 = vmatpush3.msra.mxu0 %v375_v50  ;;  %1712 = vmatprep.mubr.msk.f32.mxu0 %vm2041_vm0, %v2040_v1 }
  0x32   : > { %1710 = vmatprep.subr.mxu0 %v2040_v1  ;;  %1744 = vmatpush3.msra.mxu1 %v375_v50  ;;  %v373_v59 = vadd.f32 %v372_v57, %v371_v55 }
  0x33   : > { %1711 = vmatpush3.msra.mxu0 %v374_v53  ;;  %1745 = vmatprep.subr.mxu1 %v2040_v1 }
  0x34   : > { %1713 = vmatmul.mubr.f32.vlgmr.msra.gmra.mxu0 %v352_v56  ;;  %1746 = vmatpush3.msra.mxu1 %v374_v53  ;;  %v1550_v56 = vld [vmem:[%s2538_s3] ss:$0 sm:$0xff] }
  0x35   : > { %1747 = vmatprep.mubr.msk.f32.mxu1 %vm2041_vm0, %v2040_v1  ;;  %1750 = vmatprep.subr.mxu0 %v2040_v1 }
  0x36   : > { %1751 = vmatpush3.msra.mxu0 %v541_v58  ;;  %1758 = vmatprep.mubr.msk.f32.mxu0 %vm2041_vm0, %v2040_v1 }
  0x37   : > { %1748 = vmatmul.mubr.f32.vlgmr.msra.gmra.mxu1 %v373_v59  ;;  %1752 = vmatprep.subr.mxu0 %v2040_v1 }
  0x38   : > { %1753 = vmatpush3.msra.mxu0 %v540_v60  ;;  %1772 = vmatprep.subr.bf16.mxu1 %v1899_v19 }
  0x39   : > { %1754 = vmatprep.subr.mxu0 %v2040_v1  ;;  %1773 = vmatpush3.bf16.msra.mxu1 %v1899_v19 }
  0x3a   : > { %1755 = vmatpush3.msra.mxu0 %v539_v61  ;;  %1774 = vmatprep.subr.bf16.mxu1 %v1903_v21 }
  0x3b   : > { %1756 = vmatprep.subr.mxu0 %v2040_v1 }
  0x3c   : > { %1757 = vmatpush3.msra.mxu0 %v538_v62 }
  0x3d   : > { %1761 = vmatprep.subr.mxu0 %v2040_v1  ;;  %1775 = vmatpush3.bf16.msra.mxu1 %v1903_v21 }
  0x3e   : > { %1776 = vmatprep.subr.bf16.mxu1 %v1907_v24 }
  0x41   : > { %1777 = vmatpush3.bf16.msra.mxu1 %v1907_v24 }
  0x42   : > { %1778 = vmatprep.subr.bf16.mxu1 %v1911_v28 }
  0x45   : > { %1779 = vmatpush3.bf16.msra.mxu1 %v1911_v28 }
  0x46   : > { %1780 = vmatprep.subr.bf16.mxu1 %v1915_v31 }
  0x49   : > { %1781 = vmatpush3.bf16.msra.mxu1 %v1915_v31 }
  0x4a   : > { %1782 = vmatprep.subr.bf16.mxu1 %v1919_v35 }
  0x4d   : > { %1783 = vmatpush3.bf16.msra.mxu1 %v1919_v35 }
  0x4e   : > { %1784 = vmatprep.subr.bf16.mxu1 %v1923_v38 }
  0x51   : > { %1785 = vmatpush3.bf16.msra.mxu1 %v1923_v38 }
  0x52   : > { %1786 = vmatprep.subr.bf16.mxu1 %v1927_v40 }
  0x55   : > { %1787 = vmatpush3.bf16.msra.mxu1 %v1927_v40 }
  0xf4   : > { %v456_v63 = vpop.f32.mrf.mxu0 }
  0xf5   : > { %v531_v0 = vmul.f32 0.00390625, %v456_v63 }
  0xf6   : > { %v1714_v2 = vpop.f32.mrf.mxu0 }
  0xf7   : > { %v533_v3 = vmul.f32 %v531_v0, %v531_v0  ;;  %v526_v4 = vpop.f32.mrf.mxu1  ;;  %1759 = vmatmul.mubr.msk.f32.vlgmr.msra.gmra.mxu0 %vm542_vm1, %v531_v0 }
  0xf8   : > { %v532_v8 = vmul.f32 0.00390625, %v526_v4  ;;  %1762 = vmatpush3.msra.mxu0 %v541_v58  ;;  %1769 = vmatprep.mubr.msk.f32.mxu0 %vm2041_vm0, %v2040_v1 }
  0xf9   : > { %v1749_v10 = vpop.f32.mrf.mxu1  ;;  %1763 = vmatprep.subr.mxu0 %v2040_v1 }
  0xfa   : > { %v534_v11 = vsub.f32 %v532_v8, %v533_v3  ;;  %1764 = vmatpush3.msra.mxu0 %v540_v60 }
  0xfb   : > { %1765 = vmatprep.subr.mxu0 %v2040_v1 }
  0xfc   : > { %v535_v12 = vmax.f32 %v534_v11, 0.0  ;;  %1766 = vmatpush3.msra.mxu0 %v539_v61 }
  0xfd   : > { %1767 = vmatprep.subr.mxu0 %v2040_v1  ;;  %v1902_v1 = vld [vmem:[%s2540_s5 + $0x94] ss:$12 sps:$4 sm:$0xff]  }
  0xfe   : > { %v536_v13 = vadd.f32 1e-06, %v535_v12  ;;  %1768 = vmatpush3.msra.mxu0 %v538_v62 }
  0xff   : > { %924 = vmatprep.subr.bf16.mxu0 %v1898_v16 }
 0x100   : > { %1936 = vrsqrt.f32 %v536_v13 }
 0x10d   : > { %v1937_v15 = vpop.eup %1936 }
 0x10e   : > { %1770 = vmatmul.mubr.msk.f32.vlgmr.msra.gmra.mxu0 %vm542_vm1, %v1937_v15 }
 0x10f   : > { %925 = vmatpush1.bf16.msra.mxu0 %v1896_v18  ;;  %956 = vmatprep.mubr.bf16.mxu0 %v2042_v42 }
 0x110   : > { %926 = vmatprep.subr.bf16.mxu0 %v1902_v1 }
 0x113   : > { %927 = vmatpush1.bf16.msra.mxu0 %v1900_v20 }
 0x114   : > { %928 = vmatprep.subr.bf16.mxu0 %v1906_v23 }
 0x117   : > { %929 = vmatpush1.bf16.msra.mxu0 %v1904_v25  ;;  %v779_v25 = vld [vmem:[%s2541_s6] sm:$0x7] }
 0x118   : > { %930 = vmatprep.subr.bf16.mxu0 %v1910_v26  ;;  %v2401_v28 = vrot.slane %v779_v25, %v691_v47 }
 0x11b   : > { %931 = vmatpush1.bf16.msra.mxu0 %v1908_v29 }
 0x11c   : > { %932 = vmatprep.subr.bf16.mxu0 %v1914_v30 }
 0x11f   : > { %933 = vmatpush1.bf16.msra.mxu0 %v1912_v32 }
 0x120   : > { %934 = vmatprep.subr.bf16.mxu0 %v1918_v33 }
 0x123   : > { %935 = vmatpush1.bf16.msra.mxu0 %v1916_v34 }
 0x124   : > { %936 = vmatprep.subr.bf16.mxu0 %v1922_v36 }
 0x127   : > { %937 = vmatpush1.bf16.msra.mxu0 %v1920_v37 }
 0x128   : > { %938 = vmatprep.subr.bf16.mxu0 %v1926_v39  ;;  %v791_v39 = vsub.s32 2, %v2381_v46 }
 0x12b   : > { %939 = vmatpush1.bf16.msra.mxu0 %v1924_v41 }
 0x1b7   : > { %v612_v43 = vpop.f32.mrf.mxu0 }
 0x1b8   : > { %v692_v48 = vrot.slane %v612_v43, %v691_v47 }
 0x1b9   : > { %v1760_v44 = vpop.f32.mrf.mxu0 }
 0x1ba   : > { %v693_v50 = vsub.f32 %v2170_v5, %v692_v48  ;;  %v694_v52 = vsub.f32 %v2173_v6, %v692_v48  ;;  %v695_v53 = vsub.f32 %v2176_v7, %v692_v48  ;;  %v696_v54 = vsub.f32 %v2184_v9, %v692_v48  ;;  %v1551_v6 = vld [vmem:[%s2539_s4] ss:$0 sm:$0xff] }
 0x1bb   : > { %v697_v57 = vsub.f32 %v2196_v14, %v692_v48  ;;  %v698_v58 = vsub.f32 %v2206_v17, %v692_v48  ;;  %v699_v9 = vsub.f32 %v2217_v22, %v692_v48  ;;  %v700_v63 = vsub.f32 %v2228_v27, %v692_v48 }
 0x1bc   : > { %v792_v44 = vrot.slane %v779_v25, %v791_v39 }
 0x1ce   : > { %v685_v49 = vpop.f32.mrf.mxu0 }
 0x1cf   : > { %v704_v51 = vrot.slane %v685_v49, %v691_v47 }
 0x1d0   : > { %v1771_v55 = vpop.f32.mrf.mxu0 }
 0x1d1   : > { %v705_v59 = vmul.f32 %v704_v51, %v693_v50  ;;  %v706_v60 = vmul.f32 %v704_v51, %v694_v52  ;;  %v707_v61 = vmul.f32 %v704_v51, %v695_v53  ;;  %v708_v5 = vmul.f32 %v704_v51, %v696_v54 }
 0x1d2   : > { %v709_v7 = vmul.f32 %v704_v51, %v697_v57  ;;  %v710_v62 = vmul.f32 %v704_v51, %v698_v58  ;;  %v711_v8 = vmul.f32 %v704_v51, %v699_v9  ;;  %v712_v10 = vmul.f32 %v704_v51, %v700_v63 }
 0x1d3   : > { %v720_v0 = vmul.f32 %v1550_v56, %v705_v59  ;;  %v721_v2 = vmul.f32 %v1550_v56, %v706_v60  ;;  %v722_v3 = vmul.f32 %v1550_v56, %v707_v61  ;;  %v723_v14 = vmul.f32 %v1550_v56, %v708_v5 }
 0x1d4   : > { %v724_v4 = vmul.f32 %v1550_v56, %v709_v7  ;;  %v725_v17 = vmul.f32 %v1550_v56, %v710_v62  ;;  %v726_v20 = vmul.f32 %v1550_v56, %v711_v8  ;;  %v727_v22 = vmul.f32 %v1550_v56, %v712_v10 }
 0x1d5   : > { %v735_v11 = vadd.f32 %v1551_v6, %v720_v0  ;;  %v736_v12 = vadd.f32 %v1551_v6, %v721_v2  ;;  %v737_v13 = vadd.f32 %v1551_v6, %v722_v3  ;;  %v738_v15 = vadd.f32 %v1551_v6, %v723_v14 }
 0x1d6   : > { %v739_v16 = vadd.f32 %v1551_v6, %v724_v4  ;;  %v740_v18 = vadd.f32 %v1551_v6, %v725_v17  ;;  %v741_v21 = vadd.f32 %v1551_v6, %v726_v20  ;;  %v742_v23 = vadd.f32 %v1551_v6, %v727_v22 }
 0x1d7   : > { %v743_v19 = vpack.c.bf16 %v736_v12, %v735_v11  ;;  %v744_v1 = vpack.c.bf16 %v738_v15, %v737_v13  ;;  %v787_v9 = vsub.s32 1, %v2381_v46 }
 0x1d8   : > { %v745_v27 = vpack.c.bf16 %v740_v18, %v739_v16  ;;  %v746_v24 = vpack.c.bf16 %v742_v23, %v741_v21 }
 0x1d9   : > { %957 = vmatmul.mubr.bf16.vlgmr.msra.gmra.mxu0 %v743_v19  ;;  %1788 = vmatprep.mubr.bf16.mxu1 %v743_v19  ;;  %v788_v3 = vrot.slane %v779_v25, %v787_v9 }
 0x1da   : > { %1789 = vmatmul.mubr.bf16.vlgmr.msra.gmra.mxu1 %v744_v1  ;;  %966 = vmatprep.mubr.bf16.mxu0 %v2042_v42 }
 0x1db   : > { %1792 = vmatprep.mubr.bf16.mxu1 %v745_v27 }
 0x1e1   : > { %967 = vmatmul.mubr.bf16.gmra.mxu0 %v744_v1 }
 0x1e2   : > { %1793 = vmatmul.mubr.bf16.gmra.mxu1 %v746_v24  ;;  %976 = vmatprep.mubr.bf16.mxu0 %v2042_v42 }
 0x1e9   : > { %977 = vmatmul.mubr.bf16.gmra.mxu0 %v745_v27 }
 0x1ea   : > { %986 = vmatprep.mubr.bf16.mxu0 %v2042_v42 }
 0x1f1   : > { %987 = vmatmul.mubr.bf16.gmra.mxu0 %v746_v24 }
 0x299   : > { %v958_v26 = vpop.f32.mrf.mxu0 }
 0x29a   : > { %v1790_v29 = vpop.f32.mrf.mxu1  ;;  %v959_v33 = vadd.f32 %v958_v26, %v2401_v28 }
 0x29b   : > { %v2403_v30 = vpop.f32.mrf.mxu0  ;;  %v1040_v59 = vadd.f32 %v1790_v29, %v792_v44 }
 0x29c   : > { %v1031_v31 = vpop.f32.mrf.mxu1  ;;  %v961_v18 = vadd.f32 %v2403_v30, %v788_v3 }
 0x29d   : > { %v962_v32 = vpop.f32.mrf.mxu0  ;;  %v1032_v7 = vadd.f32 %v1031_v31, %v792_v44 }
 0x29e   : > { %v963_v34 = vadd.f32 %v962_v32, %v2401_v28  ;;  %v1791_v35 = vpop.f32.mrf.mxu1 }
 0x29f   : > { %v964_v36 = vpop.f32.mrf.mxu0  ;;  %v1043_v56 = vadd.f32 %v1791_v35, %v792_v44 }
 0x2a0   : > { %v1062_v37 = vpack.c.bf16 %v963_v34, %v959_v33  ;;  %v1034_v38 = vpop.f32.mrf.mxu1  ;;  %v965_v16 = vadd.f32 %v964_v36, %v788_v3 }
 0x2a1   : > { %v968_v40 = vpop.f32.mrf.mxu0  ;;  %v1071_v61 = vpack.c.bf16 %v1043_v56, %v1040_v59  ;;  %v1035_v5 = vadd.f32 %v1034_v38, %v792_v44 }
 0x2a2   : > { %v1794_v41 = vpop.f32.mrf.mxu1  ;;  %1804 = vmatprep.mubr.bf16.mxu0 %v1062_v37  ;;  %v1066_v19 = vpack.c.bf16 %v965_v16, %v961_v18  ;;  %v969_v22 = vadd.f32 %v968_v40, %v2401_v28 }
 0x2a3   : > { %v970_v42 = vpop.f32.mrf.mxu0  ;;  %v1056_v48 = vadd.f32 %v1794_v41, %v792_v44  ;;  %v1070_v63 = vpack.c.bf16 %v1035_v5, %v1032_v7 }
 0x2a4   : > { %v1047_v43 = vpop.f32.mrf.mxu1  ;;  %v971_v15 = vadd.f32 %v970_v42, %v788_v3 }
 0x2a5   : > { %v972_v45 = vpop.f32.mrf.mxu0  ;;  %v1048_v52 = vadd.f32 %v1047_v43, %v792_v44 }
 0x2a6   : > { %v1795_v47 = vpop.f32.mrf.mxu1  ;;  %v973_v1 = vadd.f32 %v972_v45, %v2401_v28 }
 0x2a7   : > { %v1059_v49 = vadd.f32 %v1795_v47, %v792_v44  ;;  %v974_v50 = vpop.f32.mrf.mxu0 }
 0x2a8   : > { %v1050_v51 = vpop.f32.mrf.mxu1  ;;  %v975_v13 = vadd.f32 %v974_v50, %v788_v3  ;;  %v1063_v21 = vpack.c.bf16 %v973_v1, %v969_v22 }
 0x2a9   : > { %v1073_v53 = vpack.c.bf16 %v1059_v49, %v1056_v48  ;;  %v1051_v54 = vadd.f32 %v1050_v51, %v792_v44  ;;  %v978_v55 = vpop.f32.mrf.mxu0 }
 0x2aa   : > { %v1067_v46 = vpack.c.bf16 %v975_v13, %v971_v15  ;;  %v979_v27 = vadd.f32 %v978_v55, %v2401_v28 }
 0x2ab   : > { %v1072_v57 = vpack.c.bf16 %v1051_v54, %v1048_v52  ;;  %v980_v58 = vpop.f32.mrf.mxu0  ;;  %1812 = vmatprep.subr.bf16.mxu1 %v1073_v53 }
 0x2ac   : > { %1813 = vmatpush3.bf16.msra.mxu1 %v1073_v53  ;;  %v981_v10 = vadd.f32 %v980_v58, %v788_v3 }
 0x2ad   : > { %v982_v60 = vpop.f32.mrf.mxu0  ;;  %1814 = vmatprep.subr.bf16.mxu1 %v1072_v57 }
 0x2ae   : > { %v983_v20 = vadd.f32 %v982_v60, %v2401_v28 }
 0x2af   : > { %v984_v6 = vpop.f32.mrf.mxu0 }
 0x2b0   : > { %1815 = vmatpush3.bf16.msra.mxu1 %v1072_v57  ;;  %v985_v4 = vadd.f32 %v984_v6, %v788_v3  ;;  %v1064_v23 = vpack.c.bf16 %v983_v20, %v979_v27 }
 0x2b1   : > { %v988_v62 = vpop.f32.mrf.mxu0  ;;  %1816 = vmatprep.subr.bf16.mxu1 %v1071_v61 }
 0x2b2   : > { %v1068_v12 = vpack.c.bf16 %v985_v4, %v981_v10  ;;  %v989_v25 = vadd.f32 %v988_v62, %v2401_v28 }
 0x2b3   : > { %v990_v0 = vpop.f32.mrf.mxu0 }
 0x2b4   : > { %1817 = vmatpush3.bf16.msra.mxu1 %v1071_v61  ;;  %v991_v17 = vadd.f32 %v990_v0, %v788_v3 }
 0x2b5   : > { %v992_v2 = vpop.f32.mrf.mxu0  ;;  %1818 = vmatprep.subr.bf16.mxu1 %v1070_v63 }
 0x2b6   : > { %v993_v24 = vadd.f32 %v992_v2, %v2401_v28 }
 0x2b7   : > { %v994_v14 = vpop.f32.mrf.mxu0 }
 0x2b8   : > { %v995_v8 = vadd.f32 %v994_v14, %v788_v3  ;;  %1819 = vmatpush3.bf16.msra.mxu1 %v1070_v63  ;;  %v1065_v26 = vpack.c.bf16 %v993_v24, %v989_v25  ;;  %v1929_v24 = vld [vmem:[%s2542_s7 + $0x30] sm:$0xff]   ;;  %v1930_v25 = vld [vmem:[%s2542_s7 + $0x28] sm:$0xff]  }
 0x2ba   : > { %v1069_v11 = vpack.c.bf16 %v995_v8, %v991_v17 }
 0x2bc   : > { %1796 = vmatprep.subr.bf16.mxu0 %v1069_v11 }
 0x2bd   : > { %1797 = vmatpush3.bf16.xpose.msra.mxu0 %v1069_v11 }
 0x2be   : > { %1798 = vmatprep.subr.bf16.mxu0 %v1068_v12 }
 0x2c5   : > { %1799 = vmatpush3.bf16.xpose.msra.mxu0 %v1068_v12 }
 0x2c6   : > { %1800 = vmatprep.subr.bf16.mxu0 %v1067_v46 }
 0x2cd   : > { %1801 = vmatpush3.bf16.xpose.msra.mxu0 %v1067_v46 }
 0x2ce   : > { %1802 = vmatprep.subr.bf16.mxu0 %v1066_v19 }
 0x2d5   : > { %1803 = vmatpush3.bf16.xpose.msra.mxu0 %v1066_v19 }
 0x2dc   : > { %1805 = vmatmul.mubr.bf16.vlgmr.msra.gmra.mxu0 %v1063_v21 }
 0x2dd   : > { %1808 = vmatprep.mubr.bf16.mxu0 %v1064_v23  ;;  %v1928_v23 = vld [vmem:[%s2542_s7 + $0x38] sm:$0xff]  }
 0x2de   : > { %1828 = vmatprep.subr.bf16.mxu1 %v1928_v23 }
 0x2e4   : > { %1809 = vmatmul.mubr.bf16.gmra.mxu0 %v1065_v26  ;;  %v1931_v26 = vld [vmem:[%s2542_s7 + $0x20] sm:$0xff]  }
 0x39c   : > { %v1806_v29 = vpop.f32.mrf.mxu0 }
 0x39d   : > { %v1146_v30 = vsel %vm1139_vm2, %v1806_v29, -inf }
 0x39e   : > { %1147 = vmax.xlane.f32.xlu1 %v1146_v30  ;;  %v1108_v31 = vpop.f32.mrf.mxu0  ;;  %v1933_v30 = vld [vmem:[%s2542_s7 + $0x10] sm:$0xff]  }
 0x39f   : > { %v1140_v32 = vsel %vm1139_vm2, %v1108_v31, -inf }
 0x3a0   : > { %1141 = vmax.xlane.f32.xlu0 %v1140_v32  ;;  %v1807_v33 = vpop.f32.mrf.mxu0  ;;  %v1935_v32 = vld [vmem:[%s2542_s7] sm:$0xff]  }
 0x3a1   : > { %v1149_v34 = vsel %vm1139_vm2, %v1807_v33, -inf }
 0x3a2   : > { %1150 = vmax.xlane.f32.xlu1 %v1149_v34  ;;  %v1111_v35 = vpop.f32.mrf.mxu0 }
 0x3a3   : > { %v1143_v36 = vsel %vm1139_vm2, %v1111_v35, -inf }
 0x3a4   : > { %1144 = vmax.xlane.f32.xlu0 %v1143_v36  ;;  %v1810_v28 = vpop.f32.mrf.mxu0 }
 0x3a5   : > { %v1158_v41 = vsel %vm1139_vm2, %v1810_v28, -inf }
 0x3a6   : > { %v1124_v37 = vpop.f32.mrf.mxu0 }
 0x3a7   : > { %v1152_v38 = vsel %vm1139_vm2, %v1124_v37, -inf }
 0x3a8   : > { %1153 = vmax.xlane.f32.xlu0 %v1152_v38  ;;  %v1811_v39 = vpop.f32.mrf.mxu0 }
 0x3a9   : > { %v1161_v43 = vsel %vm1139_vm2, %v1811_v39, -inf }
 0x3aa   : > { %v1127_v40 = vpop.f32.mrf.mxu0 }
 0x3ab   : > { %v1155_v42 = vsel %vm1139_vm2, %v1127_v40, -inf }
 0x3ac   : > { %1159 = vmax.xlane.f32.xlu0 %v1158_v41  ;;  %1156 = vmax.xlane.f32.xlu1 %v1155_v42 }
 0x3b0   : > { %1162 = vmax.xlane.f32.xlu1 %v1161_v43 }
 0x427   : > { %v1148_v44 = vpop.xlane.xlu1 %1147 }
 0x428   : > { %v1166_v45 = vsub.f32 %v1806_v29, %v1148_v44  ;;  %v1932_v29 = vld [vmem:[%s2542_s7 + $0x18] sm:$0xff]  }
 0x429   : > { %v1142_v47 = vpop.xlane.xlu0 %1141 }
 0x42a   : > { %v1164_v48 = vsub.f32 %v1108_v31, %v1142_v47  ;;  %v1176_v50 = vmul.f32 1.442695, %v1166_v45  ;;  %v1934_v31 = vld [vmem:[%s2542_s7 + $0x8] sm:$0xff]  }
 0x42b   : > { %v1151_v49 = vpop.xlane.xlu1 %1150 }
 0x42c   : > { %v1172_v51 = vmul.f32 1.442695, %v1164_v48  ;;  %v1167_v52 = vsub.f32 %v1807_v33, %v1151_v49 }
 0x42d   : > { %v1145_v53 = vpop.xlane.xlu0 %1144 }
 0x42e   : > { %1938 = vpow2.f32 %v1172_v51  ;;  %v1178_v54 = vmul.f32 1.442695, %v1167_v52  ;;  %v1165_v55 = vsub.f32 %v1111_v35, %v1145_v53 }
 0x42f   : > { %1940 = vpow2.f32 %v1176_v50 }
 0x430   : > { %v1174_v56 = vmul.f32 1.442695, %v1165_v55  ;;  %1942 = vpow2.f32 %v1178_v54 }
 0x431   : > { %v1154_v57 = vpop.xlane.xlu0 %1153 }
 0x432   : > { %1944 = vpow2.f32 %v1174_v56  ;;  %v1168_v58 = vsub.f32 %v1124_v37, %v1154_v57 }
 0x434   : > { %v1180_v59 = vmul.f32 1.442695, %v1168_v58 }
 0x435   : > { %v1160_v60 = vpop.xlane.xlu0 %1159  ;;  %v1157_v61 = vpop.xlane.xlu1 %1156 }
 0x436   : > { %1946 = vpow2.f32 %v1180_v59  ;;  %v1170_v5 = vsub.f32 %v1810_v28, %v1160_v60  ;;  %v1169_v6 = vsub.f32 %v1127_v40, %v1157_v61 }
 0x438   : > { %v1184_v7 = vmul.f32 1.442695, %v1170_v5  ;;  %v1182_v62 = vmul.f32 1.442695, %v1169_v6 }
 0x439   : > { %v1163_v9 = vpop.xlane.xlu1 %1162 }
 0x43a   : > { %1948 = vpow2.f32 %v1184_v7  ;;  %v1171_v63 = vsub.f32 %v1811_v39, %v1163_v9 }
 0x43b   : > { %v1939_v0 = vpop.eup %1938  ;;  %1950 = vpow2.f32 %v1182_v62 }
 0x43c   : > { %v1186_v2 = vmul.f32 1.442695, %v1171_v63  ;;  %v1188_v3 = vsel %vm1139_vm2, %v1939_v0, 0.0  ;;  %v1941_v14 = vpop.eup %1940 }
 0x43d   : > { %1189 = vadd.xlane.f32.xlu0 %v1188_v3  ;;  %v1943_v4 = vpop.eup %1942  ;;  %v1194_v8 = vsel %vm1139_vm2, %v1941_v14, 0.0 }
 0x43e   : > { %1952 = vpow2.f32 %v1186_v2  ;;  %v1213_v12 = vpack.c.bf16 %v1943_v4, %v1941_v14  ;;  %v1197_v46 = vsel %vm1139_vm2, %v1943_v4, 0.0  ;;  %v1580_v2 = vld [vmem:[%s2543_s8] ss:$0 sm:$0xff] }
 0x43f   : > { %v1945_v17 = vpop.eup %1944 }
 0x440   : > { %v1191_v10 = vsel %vm1139_vm2, %v1945_v17, 0.0  ;;  %v1212_v11 = vpack.c.bf16 %v1945_v17, %v1939_v0  ;;  %v1970_v17 = vld [vmem:[%s2167_s21 + $0x10] sm:$0xff] }
 0x441   : > { %1195 = vadd.xlane.f32.xlu0 %v1194_v8  ;;  %1192 = vadd.xlane.f32.xlu1 %v1191_v10 }
 0x442   : > { %1820 = vmatprep.mubr.msk.bf16.mxu1 %vm1139_vm2, %v1212_v11 }
 0x443   : > { %v1947_v13 = vpop.eup %1946  ;;  %1821 = vmatmul.mubr.msk.bf16.vlgmr.msra.gmra.mxu1 %vm1139_vm2, %v1213_v12  ;;  %v1971_v12 = vld [vmem:[%s2167_s21] sm:$0xff] }
 0x444   : > { %v1200_v15 = vsel %vm1139_vm2, %v1947_v13, 0.0  ;;  %1829 = vmatpush3.bf16.msra.mxu1 %v1928_v23  ;;  %v1974_v23 = vld [vmem:[%s2167_s21 + $0x30] sm:$0xff] }
 0x445   : > { %1201 = vadd.xlane.f32.xlu0 %v1200_v15  ;;  %1198 = vadd.xlane.f32.xlu1 %v1197_v46 }
 0x446   : > { %1830 = vmatprep.subr.bf16.mxu1 %v1929_v24 }
 0x447   : > { %v1949_v16 = vpop.eup %1948 }
 0x448   : > { %v1951_v18 = vpop.eup %1950  ;;  %v1206_v19 = vsel %vm1139_vm2, %v1949_v16, 0.0  ;;  %1831 = vmatpush3.bf16.msra.mxu1 %v1929_v24 }
 0x449   : > { %1207 = vadd.xlane.f32.xlu0 %v1206_v19  ;;  %v1203_v1 = vsel %vm1139_vm2, %v1951_v18, 0.0  ;;  %v1214_v20 = vpack.c.bf16 %v1951_v18, %v1947_v13  ;;  %1832 = vmatprep.subr.bf16.mxu1 %v1930_v25 }
 0x44a   : > { %1204 = vadd.xlane.f32.xlu1 %v1203_v1  ;;  %v1973_v1 = vld [vmem:[%s2167_s21 + $0x8] sm:$0xff] }
 0x44b   : > { %v1953_v22 = vpop.eup %1952  ;;  %1824 = vmatprep.mubr.msk.bf16.mxu1 %vm1139_vm2, %v1214_v20 }
 0x44c   : > { %v1209_v27 = vsel %vm1139_vm2, %v1953_v22, 0.0  ;;  %v1215_v21 = vpack.c.bf16 %v1953_v22, %v1949_v16  ;;  %1833 = vmatpush3.bf16.msra.mxu1 %v1930_v25  ;;  %v1972_v16 = vld [vmem:[%s2167_s21 + $0x18] sm:$0xff] }
 0x44d   : > { %1834 = vmatprep.subr.bf16.mxu1 %v1931_v26 }
 0x44e   : > { %1210 = vadd.xlane.f32.xlu1 %v1209_v27  ;;  %1825 = vmatmul.mubr.msk.bf16.gmra.mxu1 %vm1139_vm2, %v1215_v21 }
 0x450   : > { %1835 = vmatpush3.bf16.msra.mxu1 %v1931_v26 }
 0x451   : > { %1836 = vmatprep.subr.bf16.mxu1 %v1932_v29 }
 0x454   : > { %1837 = vmatpush3.bf16.msra.mxu1 %v1932_v29  ;;  %v1975_v29 = vld [vmem:[%s2167_s21 + $0x20] sm:$0xff] }
 0x455   : > { %1838 = vmatprep.subr.bf16.mxu1 %v1933_v30 }
 0x458   : > { %1839 = vmatpush3.bf16.msra.mxu1 %v1933_v30 }
 0x459   : > { %1840 = vmatprep.subr.bf16.mxu1 %v1934_v31 }
 0x45c   : > { %1841 = vmatpush3.bf16.msra.mxu1 %v1934_v31 }
 0x45d   : > { %1842 = vmatprep.subr.bf16.mxu1 %v1935_v32 }
 0x460   : > { %1843 = vmatpush3.bf16.msra.mxu1 %v1935_v32 }
 0x4c6   : > { %v1190_v34 = vpop.xlane.xlu0 %1189 }
 0x4c7   : > { %1954 = vrcp.f32 %v1190_v34 }
 0x4ca   : > { %v1193_v33 = vpop.xlane.xlu1 %1192  ;;  %v1196_v36 = vpop.xlane.xlu0 %1195 }
 0x4ce   : > { %v1199_v35 = vpop.xlane.xlu1 %1198  ;;  %v1202_v37 = vpop.xlane.xlu0 %1201 }
 0x4cf   : > { %1956 = vrcp.f32 %v1199_v35 }
 0x4d0   : > { %1958 = vrcp.f32 %v1193_v33  ;;  %v1976_v33 = vld [vmem:[%s2167_s21 + $0x38] sm:$0xff] }
 0x4d1   : > { %1960 = vrcp.f32 %v1196_v36  ;;  %v1977_v36 = vld [vmem:[%s2167_s21 + $0x28] sm:$0xff] }
 0x4d2   : > { %1962 = vrcp.f32 %v1202_v37  ;;  %v1208_v40 = vpop.xlane.xlu0 %1207 }
 0x4d3   : > { %v1205_v28 = vpop.xlane.xlu1 %1204 }
 0x4d4   : > { %v1955_v42 = vpop.eup %1954 }
 0x4d7   : > { %v1211_v38 = vpop.xlane.xlu1 %1210 }
 0x4d8   : > { %1964 = vrcp.f32 %v1211_v38 }
 0x4d9   : > { %1966 = vrcp.f32 %v1205_v28 }
 0x4da   : > { %1968 = vrcp.f32 %v1208_v40 }
 0x4dc   : > { %v1957_v44 = vpop.eup %1956 }
 0x4dd   : > { %v1959_v45 = vpop.eup %1958 }
 0x4de   : > { %v1961_v49 = vpop.eup %1960 }
 0x4df   : > { %v1963_v57 = vpop.eup %1962 }
 0x4e5   : > { %v1965_v59 = vpop.eup %1964 }
 0x4e6   : > { %v1967_v60 = vpop.eup %1966 }
 0x4e7   : > { %v1969_v6 = vpop.eup %1968 }
 0x503   : > { %v1822_v39 = vpop.f32.mrf.mxu1 }
 0x504   : > { %v1303_v52 = vmul.f32 %v1961_v49, %v1822_v39 }
 0x505   : > { %v1262_v41 = vpop.f32.mrf.mxu1 }
 0x506   : > { %v1301_v50 = vmul.f32 %v1955_v42, %v1262_v41 }
 0x507   : > { %v1823_v43 = vpop.f32.mrf.mxu1 }
 0x508   : > { %v1304_v47 = vmul.f32 %v1957_v44, %v1823_v43 }
 0x509   : > { %v1265_v48 = vpop.f32.mrf.mxu1 }
 0x50a   : > { %v1302_v51 = vmul.f32 %v1959_v45, %v1265_v48  ;;  %v1310_v54 = vpack.c.bf16 %v1304_v47, %v1303_v52 }
 0x50c   : > { %v1309_v53 = vpack.c.bf16 %v1302_v51, %v1301_v50 }
 0x50e   : > { %v1826_v55 = vpop.f32.mrf.mxu1  ;;  %1844 = vmatprep.mubr.bf16.mxu1 %v1309_v53 }
 0x50f   : > { %1845 = vmatmul.mubr.bf16.vlgmr.msra.gmra.mxu1 %v1310_v54  ;;  %v1307_v9 = vmul.f32 %v1969_v6, %v1826_v55 }
 0x510   : > { %v1278_v56 = vpop.f32.mrf.mxu1 }
 0x511   : > { %v1305_v7 = vmul.f32 %v1963_v57, %v1278_v56 }
 0x512   : > { %v1827_v58 = vpop.f32.mrf.mxu1 }
 0x513   : > { %v1308_v61 = vmul.f32 %v1965_v59, %v1827_v58 }
 0x514   : > { %v1281_v5 = vpop.f32.mrf.mxu1 }
 0x515   : > { %v1306_v62 = vmul.f32 %v1967_v60, %v1281_v5  ;;  %v1312_v0 = vpack.c.bf16 %v1308_v61, %v1307_v9 }
 0x517   : > { %v1311_v63 = vpack.c.bf16 %v1306_v62, %v1305_v7 }
 0x519   : > { %1848 = vmatprep.mubr.bf16.mxu1 %v1311_v63 }
 0x51a   : > { %1849 = vmatmul.mubr.bf16.gmra.mxu1 %v1312_v0 }
 0x5cf   : > { %v1846_v3 = vpop.f32.mrf.mxu1 }
 0x5d0   : > { %v1427_v14 = vadd.f32 %v1846_v3, %v1580_v2 }
 0x5d1   : > { %v1418_v4 = vpop.f32.mrf.mxu1 }
 0x5d2   : > { %v1451_v8 = vadd.f32 %v1970_v17, %v1427_v14  ;;  %v1419_v10 = vadd.f32 %v1580_v2, %v1418_v4 }
 0x5d3   : > { %v1847_v11 = vpop.f32.mrf.mxu1 }
 0x5d4   : > { %1459 = vst [vmem:[%s2467_s29 + $0x10] sm:$0xff] %v1451_v8  ;;  %v1449_v13 = vadd.f32 %v1971_v12, %v1419_v10  ;;  %v1430_v15 = vadd.f32 %v1847_v11, %v1580_v2 }
 0x5d5   : > { %v1421_v46 = vpop.f32.mrf.mxu1 }
 0x5d6   : > { %1457 = vst [vmem:[%s2467_s29] sm:$0xff] %v1449_v13  ;;  %v1452_v18 = vadd.f32 %v1972_v16, %v1430_v15  ;;  %v1422_v19 = vadd.f32 %v1580_v2, %v1421_v46 }
 0x5d8   : > { %1460 = vst [vmem:[%s2467_s29 + $0x18] sm:$0xff] %v1452_v18  ;;  %v1450_v20 = vadd.f32 %v1973_v1, %v1422_v19 }
 0x5da   : > { %1458 = vst [vmem:[%s2467_s29 + $0x8] sm:$0xff] %v1450_v20  ;;  %v1850_v22 = vpop.f32.mrf.mxu1 }
 0x5db   : > { %v1443_v27 = vadd.f32 %v1850_v22, %v1580_v2 }
 0x5dc   : > { %v1434_v21 = vpop.f32.mrf.mxu1 }
 0x5dd   : > { %v1455_v24 = vadd.f32 %v1974_v23, %v1443_v27  ;;  %v1435_v25 = vadd.f32 %v1580_v2, %v1434_v21 }
 0x5de   : > { %v1851_v26 = vpop.f32.mrf.mxu1 }
 0x5df   : > { %1463 = vst [vmem:[%s2467_s29 + $0x30] sm:$0xff] %v1455_v24  ;;  %v1453_v30 = vadd.f32 %v1975_v29, %v1435_v25  ;;  %v1446_v31 = vadd.f32 %v1851_v26, %v1580_v2 }
 0x5e0   : > { %v1437_v32 = vpop.f32.mrf.mxu1 }
 0x5e1   : > { %1461 = vst [vmem:[%s2467_s29 + $0x20] sm:$0xff] %v1453_v30  ;;  %v1456_v34 = vadd.f32 %v1976_v33, %v1446_v31  ;;  %v1438_v35 = vadd.f32 %v1580_v2, %v1437_v32 }
 0x5e3   : > { %1464 = vst [vmem:[%s2467_s29 + $0x38] sm:$0xff] %v1456_v34  ;;  %v1454_v28 = vadd.f32 %v1977_v36, %v1438_v35 }
 0x5e5   : > { %1462 = vst [vmem:[%s2467_s29 + $0x28] sm:$0xff] %v1454_v28 }
 0x5e6   : > { %1991 = shalt.err (!%p1988_p3)
}
 0x5e7   : > { %s1992_s21 = scalar_lea.hbm %s2486_s23, 1024  ;;  %s1996_s14 = scalar_lea.hbm %s2544_s9, 2048 }
 0x5e8   : > { %p1993_p4 = scmp.ne.s32.totalorder %s2486_s23, %s1992_s21  ;;  %p1997_p9 = scmp.lt.s32.totalorder %s2486_s23, %s2544_s9 }
 0x5e9   : > { %p1998_p10 = scmp.lt.s32.totalorder %s1996_s14, %s1992_s21 }
 0x5ea   : > { %p1994_p7 = pnand %p1993_p4, %p2134_p5 }
 0x5eb   : > { %p1999_p11 = por %p1998_p10, %p1997_p9 }
 0x5ec   : > { %p1995_p8 = pneg %p1994_p7 }
 0x5ee   : > { %p2000_p12 = pnand %p1999_p11, %p1995_p8 }
 0x5f0   : > { %2003 = shalt.err (!%p2000_p12)
}
 0x5f1   : > { %s2044_s24 = smov 128   ;;  %s2045_s26 = smov 8  }
 0x5f2   : > { %1852 = dma.vmem_to_hbm [thread:$0]  (%p2134_p5), %s2488_s16, 1024, %s2486_s23, %s2495_s13, %s2044_s24, %s2044_s24, %s2045_s26  }
 0x5f3 PF: > { %p1858_p13 = scmp.ge.s32.totalorder %s2038_s12, 2  ;;  %s1494_s27 = sand.u32 1, %s2026_s30  }
 0x5f4   : > { %s1495_s28 = scalar_lea.sflag [#allocation3], %s1494_s27 }
 0x5f5   : > { %p1855_p0 = pnand %p1858_p13, %p2138_p6 }
 0x5f7   : > { %p1856_p1 = pneg %p1855_p0 }
 0x5f9   : > { %2021 = dma.done.wait (%p1856_p1), %s1495_s28, 1024  }
 0x5fa   : > { %2023 = vsyncadd (%p1856_p1), %s1495_s28, 4294966272  ;;  %p19_p2 = scmp.ge.s32.totalorder %s2121_s15, 4   ;;  %s2547_s30 = smov %s2030_s10 }
 0x5fb   : > { %s2548_s10 = smov %s2034_s11  ;;  %s2549_s11 = smov %s2132_s18 }
 0x5fc   : > { %s2550_s12 = smov %s2121_s15  ;;  %21 = sbr.rel (!%p19_p2) target bundleno = 3 (0x3), region = 91 }
 0x601   :  { %1500 = vsyncpa [#allocation3], 1 }
 0x602   :  { %1502 = vsyncpa [#allocation3 + $0x1], 1 }

</bundles_post_ra>
